<compile_context>
chip_gen: v5e
topology: v5e:2x2
jax: 0.10.0
libtpu: 0.0.40
codegen_flags: <defaults>
</compile_context>

<pallas_src>
import functools

import jax
import jax.numpy as jnp
from jax.experimental import pallas as pl
from jax.experimental.pallas import tpu as pltpu


# --------------------------- generation-aware sizing ---------------------------

def _tpu_vmem_capacity_bytes():
    try:
        info = pltpu.get_tpu_info()
        cap = int(getattr(info, "vmem_capacity_bytes", 0) or 0)
        if cap > 0:
            return cap
    except Exception:
        pass
    return 64 * 1024 * 1024          # conservative fallback (= v7x physical VMEM)


_VMEM_CAP = _tpu_vmem_capacity_bytes()
# Never request the full physical VMEM (v7x only has 64 MiB per TensorCore):
# leave headroom for the compiler's own scratch / double buffering.
_VMEM_LIMIT = min(96 * 1024 * 1024, (_VMEM_CAP * 3) // 4)
# Per-grid-step working-set target for the row-banded convs
# (~24 MiB on v5e/v6e, ~12 MiB on v7x).
_BAND_BUDGET = max(8 * 1024 * 1024, _VMEM_LIMIT // 4)
_IM2COL_MAX_K = 512                   # fold 9 taps into one matmul if 9*Cin <= this
_MLP_ROWS = 4096                      # row tile for the fused per-pixel attn chain


def _cp(n_grid_axes):
    return pltpu.CompilerParams(
        dimension_semantics=("parallel",) * n_grid_axes,
        vmem_limit_bytes=_VMEM_LIMIT)


# ----------------------------- in-kernel helpers -----------------------------

def _gelu(x):
    # tanh-approximation of GELU (nn.GELU default is erf-based; diff ~1e-3)
    c = jnp.float32(0.7978845608028654)
    return 0.5 * x * (1.0 + jnp.tanh(c * (x + 0.044715 * x * x * x)))


def _apply_act(x, act):
    if act == "relu":
        return jnp.maximum(x, 0.0)
    if act == "leaky":            # LeakyReLU(negative_slope=0.2)
        return jnp.where(x > 0, x, 0.2 * x)
    if act == "gelu":
        return _gelu(x)
    if act == "sigmoid":
        return jax.nn.sigmoid(x)
    return x                      # "none"


def _conv_accum(x_ref, w_ref, im2col):
    """3x3 'valid' conv over a pre-padded row band -> (TH*W, Cout) f32 acc.

    x_ref: (1, TH+2, W+2, Cin) bf16/f32
    w_ref: (9*Cin, Cout) bf16 if im2col else (3, 3, Cin, Cout) bf16
    """
    _, hp, wp, cin = x_ref.shape
    th, w = hp - 2, wp - 2
    if im2col:
        # Fold all 9 taps into one K = 9*Cin contraction so the MXU is not
        # starved by tiny-K matmuls (Cin = 9 / 24 / 32 layers).
        cols = [x_ref[0, kh:kh + th, kw:kw + w, :].reshape(th * w, cin)
                .astype(jnp.bfloat16)
                for kh in range(3) for kw in range(3)]
        patch = jnp.concatenate(cols, axis=-1)
        return jnp.dot(patch, w_ref[...], preferred_element_type=jnp.float32)
    cout = w_ref.shape[-1]
    acc = jnp.zeros((th * w, cout), jnp.float32)
    for kh in range(3):
        for kw in range(3):
            patch = x_ref[0, kh:kh + th, kw:kw + w, :]
            patch = patch.reshape(th * w, cin).astype(jnp.bfloat16)
            acc = acc + jnp.dot(patch, w_ref[kh, kw],
                                preferred_element_type=jnp.float32)
    return acc


# --------------------------------- kernels -----------------------------------

def _conv_kernel(x_ref, w_ref, b_ref, o_ref, *, act, im2col):
    _, th, w, cout = o_ref.shape
    acc = _apply_act(_conv_accum(x_ref, w_ref, im2col) + b_ref[...], act)
    o_ref[...] = acc.reshape(1, th, w, cout).astype(o_ref.dtype)


def _conv_pw_kernel(x_ref, w_ref, b_ref, w2_ref, b2_ref, o_ref, *,
                    act, act2, im2col):
    # fused: 3x3 conv + act  ->  1x1 conv + act2   (no HBM round trip)
    _, th, w, cout2 = o_ref.shape
    acc = _apply_act(_conv_accum(x_ref, w_ref, im2col) + b_ref[...], act)
    y = jnp.dot(acc.astype(jnp.bfloat16), w2_ref[...],
                preferred_element_type=jnp.float32)
    y = _apply_act(y + b2_ref[...], act2)
    o_ref[...] = y.reshape(1, th, w, cout2).astype(o_ref.dtype)


def _conv_sal_kernel(x_ref, w_ref, b_ref, ws_ref, bs_ref, o_ref, *, im2col):
    # fused: 3x3 conv + ReLU -> 1x1 (Cout=1) -> sigmoid, lane-dense store.
    acc = jnp.maximum(_conv_accum(x_ref, w_ref, im2col) + b_ref[...], 0.0)
    # (1, Cout) x (n, Cout)^T contraction -> (1, n): the saliency row lands on
    # the lane axis, so the final store is an unmasked full-width write.
    s = jax.lax.dot_general(ws_ref[...], acc.astype(jnp.bfloat16),
                            dimension_numbers=(((1,), (1,)), ((), ())),
                            preferred_element_type=jnp.float32)
    o_ref[...] = jax.nn.sigmoid(s + bs_ref[...]).astype(o_ref.dtype)


def _attn_residual_kernel(x_ref, c2_ref,
                          w1_ref, b1_ref, w2_ref, b2_ref,
                          wa1_ref, ba1_ref, wa2_ref, ba2_ref,
                          wb1_ref, bb1_ref, wb2_ref, bb2_ref,
                          o_ref, *, c3):
    """Fused per-pixel attention chain + residual conv2 add.

    mlp(x) -> [2x] (x2 + mid-chunk -> folded Mlp) -> (+ conv2 output).
    Block / SCAB are identities (see file-level TODO), so fuse = cat(t, t, t)
    collapses into one Mlp whose fc1 row-slices are pre-summed on the host.
    """
    def mlp(t, w1, b1, w2, b2):
        h = jnp.dot(t.astype(jnp.bfloat16), w1[...],
                    preferred_element_type=jnp.float32)
        h = _gelu(h + b1[...])
        y = jnp.dot(h.astype(jnp.bfloat16), w2[...],
                    preferred_element_type=jnp.float32)
        return y + b2[...]

    x = x_ref[...]
    x2 = x[:, c3:2 * c3].astype(jnp.float32)       # pre-Mlp middle chunk
    y = mlp(x, w1_ref, b1_ref, w2_ref, b2_ref)
    y = mlp(x2 + y[:, c3:2 * c3], wa1_ref, ba1_ref, wa2_ref, ba2_ref)
    y = mlp(x2 + y[:, c3:2 * c3], wb1_ref, bb1_ref, wb2_ref, bb2_ref)
    o_ref[...] = (y + c2_ref[...].astype(jnp.float32)).astype(o_ref.dtype)


# --------------------------------- wrappers -----------------------------------

def _band_rows(H, W, Cin, Cout, in_bytes, out_bytes):
    """Largest divisor of H whose per-band VMEM working set fits the budget."""
    per_row = in_bytes * (W + 2) * Cin * 2     # double-buffered input band (+halo)
    per_row += out_bytes * W * Cout * 2        # double-buffered output band
    per_row += 4 * W * Cout                    # f32 accumulator
    per_row += 2 * W * 9 * Cin                 # bf16 im2col patch (worst case)
    rows = max(1, _BAND_BUDGET // per_row)
    if rows >= H:
        return H
    for d in range(int(rows), 0, -1):
        if H % d == 0:
            return d
    return 1


def _conv_prep(x, w, cout_final, out_bytes):
    """Shared setup for the 3x3-conv pallas_calls (padding, banding, specs)."""
    B, H, W, Cin = x.shape
    Cout = w.shape[-1]
    im2col = 9 * Cin <= _IM2COL_MAX_K
    TH = _band_rows(H, W, Cin, max(Cout, cout_final), x.dtype.itemsize, out_bytes)
    nH = H // TH
    # TODO(synk): jnp.pad is a full HBM write+read of the activation tensor;
    # an in-kernel halo would remove it (kept for robustness).
    xpad = jnp.pad(x, ((0, 0), (1, 1), (1, 1), (0, 0)))
    w_in = (w.reshape(9 * Cin, Cout) if im2col else w).astype(jnp.bfloat16)
    if nH == 1:
        x_spec = pl.BlockSpec((1, H + 2, W + 2, Cin),
                              lambda bb, hh: (bb, 0, 0, 0))
    else:
        # Row bands with a 1-row halo: element-offset indexing on the
        # (leading, untiled) row dimension of the padded input.
        x_spec = pl.BlockSpec((1, pl.Element(TH + 2), W + 2, Cin),
                              lambda bb, hh: (bb, hh * TH, 0, 0))
    w_spec = pl.BlockSpec(w_in.shape, lambda bb, hh: (0,) * w_in.ndim)
    return xpad, w_in, im2col, TH, nH, x_spec, w_spec


def conv3x3(x, w, b, act="none", pw=None, out_dtype=jnp.bfloat16):
    """3x3 / stride 1 / pad 1 conv (+act), optionally fused with a 1x1 conv."""
    B, H, W, Cin = x.shape
    Cout = w.shape[-1]
    Cfin = Cout if pw is None else pw[0].shape[-1]
    xpad, w_in, im2col, TH, nH, x_spec, w_spec = _conv_prep(
        x, w, Cfin, jnp.dtype(out_dtype).itemsize)

    args = [xpad, w_in, b.reshape(1, Cout).astype(jnp.float32)]
    in_specs = [x_spec, w_spec, pl.BlockSpec((1, Cout), lambda bb, hh: (0, 0))]
    if pw is None:
        kernel = functools.partial(_conv_kernel, act=act, im2col=im2col)
    else:
        w2, b2, act2 = pw
        args += [w2.astype(jnp.bfloat16), b2.reshape(1, Cfin).astype(jnp.float32)]
        in_specs += [pl.BlockSpec((Cout, Cfin), lambda bb, hh: (0, 0)),
                     pl.BlockSpec((1, Cfin), lambda bb, hh: (0, 0))]
        kernel = functools.partial(_conv_pw_kernel, act=act, act2=act2,
                                   im2col=im2col)
    return pl.pallas_call(
        kernel,
        out_shape=jax.ShapeDtypeStruct((B, H, W, Cfin), out_dtype),
        grid=(B, nH),
        in_specs=in_specs,
        out_specs=pl.BlockSpec((1, TH, W, Cfin), lambda bb, hh: (bb, hh, 0, 0)),
        compiler_params=_cp(2),
    )(*args)


def conv3x3_sal(x, w, b, w_sal, b_sal):
    """Fused multi_exposure[-1] (3x3 + ReLU) + Sal_map (1x1) + Sigmoid.

    Lane-dense output: a flat (1, B*H*W) f32 buffer so the final stores are
    unmasked full-lane writes.
    """
    B, H, W, Cin = x.shape
    Cout = w.shape[-1]
    xpad, w_in, im2col, TH, nH, x_spec, w_spec = _conv_prep(x, w, Cout, 4)
    sal = pl.pallas_call(
        functools.partial(_conv_sal_kernel, im2col=im2col),
        out_shape=jax.ShapeDtypeStruct((1, B * H * W), jnp.float32),
        grid=(B, nH),
        in_specs=[x_spec, w_spec,
                  pl.BlockSpec((1, Cout), lambda bb, hh: (0, 0)),
                  pl.BlockSpec((1, Cout), lambda bb, hh: (0, 0)),
                  pl.BlockSpec((1, 1), lambda bb, hh: (0, 0))],
        out_specs=pl.BlockSpec((1, TH * W), lambda bb, hh: (0, bb * nH + hh)),
        compiler_params=_cp(2),
    )(xpad, w_in, b.reshape(1, Cout).astype(jnp.float32),
      w_sal.reshape(1, Cout).astype(jnp.bfloat16),
      jnp.reshape(b_sal, (1, 1)).astype(jnp.float32))
    return sal.reshape(B, H, W)


def attn_conv2(x, c2, mlp_p, mlps_p, rows_per_tile=_MLP_ROWS):
    """attn(x) + conv2-residual, fused into one per-pixel pallas_call."""
    B, H, W, C = x.shape
    c3 = C // 3
    N = B * H * W
    tn = min(N, rows_per_tile)

    w1, b1, w2, b2 = mlp_p

    def fold(p):
        # fuse = cat(t, t, t): sum fc1's three row-slices into one (C/3, C).
        wf1, bf1, wf2, bf2 = p
        wf1_eff = wf1[:c3] + wf1[c3:2 * c3] + wf1[2 * c3:]
        return (wf1_eff.astype(jnp.bfloat16),
                bf1.reshape(1, C).astype(jnp.float32),
                wf2.astype(jnp.bfloat16),
                bf2.reshape(1, C).astype(jnp.float32))

    wa1, ba1, wa2, ba2 = fold(mlps_p[0])
    wb1, bb1, wb2, bb2 = fold(mlps_p[1])

    weights = [w1.astype(jnp.bfloat16), b1.reshape(1, C).astype(jnp.float32),
               w2.astype(jnp.bfloat16), b2.reshape(1, C).astype(jnp.float32),
               wa1, ba1, wa2, ba2, wb1, bb1, wb2, bb2]
    w_specs = [pl.BlockSpec(wt.shape, lambda i: (0, 0)) for wt in weights]

    y = pl.pallas_call(
        functools.partial(_attn_residual_kernel, c3=c3),
        out_shape=jax.ShapeDtypeStruct((N, C), jnp.bfloat16),
        grid=(pl.cdiv(N, tn),),
        in_specs=[pl.BlockSpec((tn, C), lambda i: (i, 0)),
                  pl.BlockSpec((tn, C), lambda i: (i, 0))] + w_specs,
        out_specs=pl.BlockSpec((tn, C), lambda i: (i, 0)),
        compiler_params=_cp(1),
    )(x.reshape(N, C), c2.reshape(N, C), *weights)
    return y.reshape(B, H, W, C)


# ------------------------------ parameter init --------------------------------

def _conv_params(key, kh, kw, cin, cout):
    k1, k2 = jax.random.split(key)
    fan_in = cin * kh * kw
    bound = 1.0 / (fan_in ** 0.5)
    w = jax.random.uniform(k1, (kh, kw, cin, cout), jnp.float32, -bound, bound)
    b = jax.random.uniform(k2, (cout,), jnp.float32, -bound, bound)
    return w, b


def _linear_params(key, cin, cout):
    k1, k2 = jax.random.split(key)
    bound = 1.0 / (cin ** 0.5)
    w = jax.random.uniform(k1, (cin, cout), jnp.float32, -bound, bound)
    b = jax.random.uniform(k2, (cout,), jnp.float32, -bound, bound)
    return w, b


def init_params(key):
    keys = iter(jax.random.split(key, 32))
    conv = lambda cin, cout: _conv_params(next(keys), 3, 3, cin, cout)
    lin = lambda cin, cout: _linear_params(next(keys), cin, cout)
    p = {}
    p["conv1_1"] = (conv(9, 64), conv(64, 32))
    p["conv1_2"] = (conv(9, 64), conv(64, 32))
    p["conv1_3"] = (conv(9, 64), conv(64, 32))
    p["conv2"] = conv(32, 96)
    p["conv3_0"] = conv(96, 24)          # 3x3
    p["conv3_1"] = lin(24, 24)           # 1x1
    p["conv3_2"] = conv(24, 96)          # 3x3
    p["mlp"] = lin(96, 96) + lin(96, 96)               # (w1, b1, w2, b2)
    p["mlps"] = [lin(96, 96) + lin(96, 96) for _ in range(2)]
    p["me_0"] = conv(96, 128)
    p["me_1"] = conv(128, 256)
    p["sal_map"] = lin(256, 1)           # 1x1 conv + sigmoid
    return p


# -------------------------------- model forward --------------------------------

def salicon_forward(params, raw_img, *img_mes):
    # raw_img is unused in the reference forward pass (kept for signature parity)
    del raw_img
    to_nhwc = lambda t: jnp.transpose(t, (0, 2, 3, 1)).astype(jnp.bfloat16)
    imgs = [to_nhwc(m) for m in img_mes]

    x_1 = jnp.concatenate(imgs[0:3], axis=-1)    # (B, H, W, 9)
    x_2 = jnp.concatenate(imgs[3:6], axis=-1)
    x_3 = jnp.concatenate(imgs[6:9], axis=-1)

    def conv_block(x, p):
        (wa, ba), (wb, bb) = p
        x = conv3x3(x, wa, ba, act="relu")
        x = conv3x3(x, wb, bb, act="relu")
        return x

    x_1 = conv_block(x_1, params["conv1_1"])     # (B, H, W, 32) bf16
    x_2c = conv_block(x_2, params["conv1_2"])
    x_3 = conv_block(x_3, params["conv1_3"])
    x = jnp.concatenate([x_1, x_2c, x_3], axis=-1)   # (B, H, W, 96) bf16

    c2 = conv3x3(x_2c, *params["conv2"], act="none")
    # fused attention chain + residual add (one pallas_call over row tiles)
    y = attn_conv2(x, c2, params["mlp"], params["mlps"])

    # conv3: (3x3 -> LeakyReLU -> 1x1 -> LeakyReLU) fused, then 3x3
    w30, b30 = params["conv3_0"]
    w31, b31 = params["conv3_1"]
    y = conv3x3(y, w30, b30, act="leaky", pw=(w31, b31, "leaky"))
    y = conv3x3(y, *params["conv3_2"], act="none")

    # multi_exposure[0] (3x3 + ReLU)
    y = conv3x3(y, *params["me_0"], act="relu")
    # multi_exposure[1] (3x3 + ReLU) + Sal_map (1x1) + Sigmoid, fused
    w_s, b_s = params["sal_map"]
    sal = conv3x3_sal(y, *params["me_1"], w_s, b_s)   # (B, H, W) f32
    return sal[:, None, :, :]                         # NCHW (B, 1, H, W)


# ----------------------------------- main --------------------------------------

if __name__ == "__main__":
    key = jax.random.PRNGKey(0)
    B, H, W = 2, 16, 16
    pkey, dkey, ckey = jax.random.split(key, 3)
    params = init_params(pkey)

    # sanity-check the conv kernel (im2col path: Cin=9, per-tap path: Cin=96)
    for cin, cout in ((9, 16), (96, 32)):
        k1, k2, ckey = jax.random.split(ckey, 3)
        xx = jax.random.normal(k1, (1, H, W, cin), jnp.float32)
        ww, bb = _conv_params(k2, 3, 3, cin, cout)
        got = conv3x3(xx, ww, bb, act="none").astype(jnp.float32)
        ref = jax.lax.conv_general_dilated(
            xx, ww, (1, 1), "SAME",
            dimension_numbers=("NHWC", "HWIO", "NHWC")) + bb.reshape(1, 1, 1, -1)
        assert bool(jnp.allclose(got, ref, rtol=5e-2, atol=5e-2))

    dkeys = jax.random.split(dkey, 10)
    raw_img = jax.random.normal(dkeys[0], (B, 3, H, W), jnp.float32)
    img_mes = [jax.random.normal(dkeys[i + 1], (B, 3, H, W), jnp.float32)
               for i in range(9)]

    forward = jax.jit(salicon_forward)
    out = jax.block_until_ready(forward(params, raw_img, *img_mes))
    assert out.shape == (B, 1, H, W), out.shape
    assert bool(jnp.all((out >= 0.0) & (out <= 1.0)))
    print("KERNEL_OK")
</pallas_src>

<mosaic_0001>
module attributes {stable_mosaic.version = 11 : i64} {
  func.func @_conv_kernel(%arg0: i32, %arg1: i32, %arg2: memref<1x18x18x9xf32, #tpu.memory_space<vmem>>, %arg3: memref<81x16xbf16, #tpu.memory_space<vmem>>, %arg4: memref<1x16xf32, #tpu.memory_space<vmem>>, %arg5: memref<1x16x16x16xbf16, #tpu.memory_space<vmem>>) attributes {dimension_semantics = [#tpu.dimension_semantics<parallel>, #tpu.dimension_semantics<parallel>], iteration_bounds = array<i64: 1, 1>, scalar_prefetch = 0 : i64, scratch_operands = 0 : i64, tpu.core_type = #tpu.core_type<tc>, window_params = [{transform_indices = @transform_0, window_bounds = array<i64: 1, 18, 18, 9>}, {pipeline_mode = #tpu.pipeline_mode<synchronous>, transform_indices = @transform_1, window_bounds = array<i64: 81, 16>}, {pipeline_mode = #tpu.pipeline_mode<synchronous>, transform_indices = @transform_2, window_bounds = array<i64: 1, 16>}, {transform_indices = @transform_3, window_bounds = array<i64: 1, 16, 16, 16>}]} {
    %c0 = arith.constant 0 : index
    %c0_0 = arith.constant 0 : index
    %c0_1 = arith.constant 0 : index
    %c0_2 = arith.constant 0 : index
    %0 = vector.load %arg2[%c0, %c0_0, %c0_1, %c0_2] : memref<1x18x18x9xf32, #tpu.memory_space<vmem>>, vector<1x16x16x9xf32>
    %1 = vector.shape_cast %0 : vector<1x16x16x9xf32> to vector<16x16x9xf32>
    %2 = vector.shape_cast %1 : vector<16x16x9xf32> to vector<256x9xf32>
    %3 = arith.truncf %2 : vector<256x9xf32> to vector<256x9xbf16>
    %c0_3 = arith.constant 0 : index
    %c0_4 = arith.constant 0 : index
    %c1 = arith.constant 1 : index
    %c0_5 = arith.constant 0 : index
    %4 = vector.load %arg2[%c0_3, %c0_4, %c1, %c0_5] : memref<1x18x18x9xf32, #tpu.memory_space<vmem>>, vector<1x16x16x9xf32>
    %5 = vector.shape_cast %4 : vector<1x16x16x9xf32> to vector<16x16x9xf32>
    %6 = vector.shape_cast %5 : vector<16x16x9xf32> to vector<256x9xf32>
    %7 = arith.truncf %6 : vector<256x9xf32> to vector<256x9xbf16>
    %c0_6 = arith.constant 0 : index
    %c0_7 = arith.constant 0 : index
    %c2 = arith.constant 2 : index
    %c0_8 = arith.constant 0 : index
    %8 = vector.load %arg2[%c0_6, %c0_7, %c2, %c0_8] : memref<1x18x18x9xf32, #tpu.memory_space<vmem>>, vector<1x16x16x9xf32>
    %9 = vector.shape_cast %8 : vector<1x16x16x9xf32> to vector<16x16x9xf32>
    %10 = vector.shape_cast %9 : vector<16x16x9xf32> to vector<256x9xf32>
    %11 = arith.truncf %10 : vector<256x9xf32> to vector<256x9xbf16>
    %c0_9 = arith.constant 0 : index
    %c1_10 = arith.constant 1 : index
    %c0_11 = arith.constant 0 : index
    %c0_12 = arith.constant 0 : index
    %12 = vector.load %arg2[%c0_9, %c1_10, %c0_11, %c0_12] : memref<1x18x18x9xf32, #tpu.memory_space<vmem>>, vector<1x16x16x9xf32>
    %13 = vector.shape_cast %12 : vector<1x16x16x9xf32> to vector<16x16x9xf32>
    %14 = vector.shape_cast %13 : vector<16x16x9xf32> to vector<256x9xf32>
    %15 = arith.truncf %14 : vector<256x9xf32> to vector<256x9xbf16>
    %c0_13 = arith.constant 0 : index
    %c1_14 = arith.constant 1 : index
    %c1_15 = arith.constant 1 : index
    %c0_16 = arith.constant 0 : index
    %16 = vector.load %arg2[%c0_13, %c1_14, %c1_15, %c0_16] : memref<1x18x18x9xf32, #tpu.memory_space<vmem>>, vector<1x16x16x9xf32>
    %17 = vector.shape_cast %16 : vector<1x16x16x9xf32> to vector<16x16x9xf32>
    %18 = vector.shape_cast %17 : vector<16x16x9xf32> to vector<256x9xf32>
    %19 = arith.truncf %18 : vector<256x9xf32> to vector<256x9xbf16>
    %c0_17 = arith.constant 0 : index
    %c1_18 = arith.constant 1 : index
    %c2_19 = arith.constant 2 : index
    %c0_20 = arith.constant 0 : index
    %20 = vector.load %arg2[%c0_17, %c1_18, %c2_19, %c0_20] : memref<1x18x18x9xf32, #tpu.memory_space<vmem>>, vector<1x16x16x9xf32>
    %21 = vector.shape_cast %20 : vector<1x16x16x9xf32> to vector<16x16x9xf32>
    %22 = vector.shape_cast %21 : vector<16x16x9xf32> to vector<256x9xf32>
    %23 = arith.truncf %22 : vector<256x9xf32> to vector<256x9xbf16>
    %c0_21 = arith.constant 0 : index
    %c2_22 = arith.constant 2 : index
    %c0_23 = arith.constant 0 : index
    %c0_24 = arith.constant 0 : index
    %24 = vector.load %arg2[%c0_21, %c2_22, %c0_23, %c0_24] : memref<1x18x18x9xf32, #tpu.memory_space<vmem>>, vector<1x16x16x9xf32>
    %25 = vector.shape_cast %24 : vector<1x16x16x9xf32> to vector<16x16x9xf32>
    %26 = vector.shape_cast %25 : vector<16x16x9xf32> to vector<256x9xf32>
    %27 = arith.truncf %26 : vector<256x9xf32> to vector<256x9xbf16>
    %c0_25 = arith.constant 0 : index
    %c2_26 = arith.constant 2 : index
    %c1_27 = arith.constant 1 : index
    %c0_28 = arith.constant 0 : index
    %28 = vector.load %arg2[%c0_25, %c2_26, %c1_27, %c0_28] : memref<1x18x18x9xf32, #tpu.memory_space<vmem>>, vector<1x16x16x9xf32>
    %29 = vector.shape_cast %28 : vector<1x16x16x9xf32> to vector<16x16x9xf32>
    %30 = vector.shape_cast %29 : vector<16x16x9xf32> to vector<256x9xf32>
    %31 = arith.truncf %30 : vector<256x9xf32> to vector<256x9xbf16>
    %c0_29 = arith.constant 0 : index
    %c2_30 = arith.constant 2 : index
    %c2_31 = arith.constant 2 : index
    %c0_32 = arith.constant 0 : index
    %32 = vector.load %arg2[%c0_29, %c2_30, %c2_31, %c0_32] : memref<1x18x18x9xf32, #tpu.memory_space<vmem>>, vector<1x16x16x9xf32>
    %33 = vector.shape_cast %32 : vector<1x16x16x9xf32> to vector<16x16x9xf32>
    %34 = vector.shape_cast %33 : vector<16x16x9xf32> to vector<256x9xf32>
    %35 = arith.truncf %34 : vector<256x9xf32> to vector<256x9xbf16>
    %36 = tpu.concatenate %3, %7, %11, %15, %19, %23, %27, %31, %35 in 1 : vector<256x9xbf16>, vector<256x9xbf16>, vector<256x9xbf16>, vector<256x9xbf16>, vector<256x9xbf16>, vector<256x9xbf16>, vector<256x9xbf16>, vector<256x9xbf16>, vector<256x9xbf16> -> vector<256x81xbf16>
    %c0_33 = arith.constant 0 : index
    %c0_34 = arith.constant 0 : index
    %37 = vector.load %arg3[%c0_33, %c0_34] : memref<81x16xbf16, #tpu.memory_space<vmem>>, vector<81x16xbf16>
    %cst = arith.constant dense<0.000000e+00> : vector<256x16xf32>
    %38 = tpu.matmul %36, %37, %cst {dimension_numbers = #tpu.dot_dimension_numbers<[1], [0], [0], [1], [0, 0, 1, 1], [], []>} : vector<256x81xbf16>, vector<81x16xbf16>, vector<256x16xf32> -> vector<256x16xf32>
    %c0_35 = arith.constant 0 : index
    %c0_36 = arith.constant 0 : index
    %39 = vector.load %arg4[%c0_35, %c0_36] : memref<1x16xf32, #tpu.memory_space<vmem>>, vector<1x16xf32>
    %40 = vector.broadcast %39 : vector<1x16xf32> to vector<256x16xf32>
    %41 = arith.addf %38, %40 : vector<256x16xf32>
    %42 = vector.shape_cast %41 : vector<256x16xf32> to vector<1x16x16x16xf32>
    %43 = arith.truncf %42 : vector<1x16x16x16xf32> to vector<1x16x16x16xbf16>
    %c0_37 = arith.constant 0 : index
    %c0_38 = arith.constant 0 : index
    %c0_39 = arith.constant 0 : index
    %c0_40 = arith.constant 0 : index
    %44 = vector.load %arg5[%c0_37, %c0_38, %c0_39, %c0_40] : memref<1x16x16x16xbf16, #tpu.memory_space<vmem>>, vector<1x16x16x16xbf16>
    tpu.vector_store %arg5[%c0_37, %c0_38, %c0_39, %c0_40], %43 {strides = array<i32>} : memref<1x16x16x16xbf16, #tpu.memory_space<vmem>>, vector<1x16x16x16xbf16>,
    return
  }
  func.func @transform_0(%arg0: i32, %arg1: i32) -> (i32, i32, i32, i32) {
    %c0_i32 = arith.constant 0 : i32
    %c0_i32_0 = arith.constant 0 : i32
    %c0_i32_1 = arith.constant 0 : i32
    %c0_i32_2 = arith.constant 0 : i32
    return %arg0, %c0_i32, %c0_i32_0, %c0_i32_1 : i32, i32, i32, i32
  }
  func.func @transform_1(%arg0: i32, %arg1: i32) -> (i32, i32) {
    %c0_i32 = arith.constant 0 : i32
    %c0_i32_0 = arith.constant 0 : i32
    %c0_i32_1 = arith.constant 0 : i32
    return %c0_i32, %c0_i32_0 : i32, i32
  }
  func.func @transform_2(%arg0: i32, %arg1: i32) -> (i32, i32) {
    %c0_i32 = arith.constant 0 : i32
    %c0_i32_0 = arith.constant 0 : i32
    %c0_i32_1 = arith.constant 0 : i32
    return %c0_i32, %c0_i32_0 : i32, i32
  }
  func.func @transform_3(%arg0: i32, %arg1: i32) -> (i32, i32, i32, i32) {
    %c0_i32 = arith.constant 0 : i32
    %c0_i32_0 = arith.constant 0 : i32
    %c0_i32_1 = arith.constant 0 : i32
    return %arg0, %arg1, %c0_i32, %c0_i32_0 : i32, i32, i32, i32
  }
}

</mosaic_0001>

<bundles_post_ra>
// kernel: tpu_custom_call.1
= control target key start
LH: loop header
LB: loop body
LE: loop exit
PB: predicated region body
PF: predicated region fallthrough
CT: control target
= control target key end

     0   :  { %s2399_s9 = smov 9   ;;  %s3671_s0 = inlined_call_operand.vmem [shape: f32[1,18,18,9], index: 0, kind: input, shape index: {}]   ;;  %s3672_s1 = inlined_call_operand.vmem [shape: bf16[81,16], index: 1, kind: input, shape index: {}]   ;;  %s3673_s2 = inlined_call_operand.vmem [shape: f32[1,16], index: 2, kind: input, shape index: {}]   ;;  %s3674_s3 = inlined_call_operand.hbm [shape: bf16[1,16,16,16], index: 3, kind: output, shape index: {}]  }
   0x1   :  { %v88_v0 = vld [vmem:[%s3671_s0 + $0x61] sm:$0xff]  ;;  %v89_v1 = vld [vmem:[%s3671_s0 + $0x69] sm:$0xff]  ;;  %v84_v2 = vld [vmem:[%s3671_s0 + $0x31] sm:$0xff] }
   0x2   :  { %v120_v3 = vpack.c.bf16 %v88_v0, %v88_v0  ;;  %v121_v4 = vpack.c.bf16 %v89_v1, %v89_v1  ;;  %v85_v5 = vld [vmem:[%s3671_s0 + $0x39] sm:$0xff]  ;;  %v116_v6 = vpack.c.bf16 %v84_v2, %v84_v2  ;;  %v80_v7 = vld [vmem:[%s3671_s0 + $0x1] sm:$0xff]  ;;  %v81_v8 = vld [vmem:[%s3671_s0 + $0x9] sm:$0xff] }
   0x3   :  { %v117_v9 = vpack.c.bf16 %v85_v5, %v85_v5  ;;  %v112_v10 = vpack.c.bf16 %v80_v7, %v80_v7  ;;  %v113_v11 = vpack.c.bf16 %v81_v8, %v81_v8  ;;  %v90_v12 = vld [vmem:[%s3671_s0 + $0x79] sm:$0xff]  ;;  %v91_v13 = vld [vmem:[%s3671_s0 + $0x81] sm:$0xff]  ;;  %v86_v14 = vld [vmem:[%s3671_s0 + $0x49] sm:$0xff] }
   0x4   :  { %v714_v15 = vunpack.c.l.b16 %v120_v3  ;;  %v715_v16 = vunpack.c.l.b16 %v121_v4  ;;  %v710_v17 = vunpack.c.l.b16 %v116_v6  ;;  %v122_v18 = vpack.c.bf16 %v90_v12, %v90_v12  ;;  %v87_v19 = vld [vmem:[%s3671_s0 + $0x51] sm:$0xff]  ;;  %v82_v20 = vld [vmem:[%s3671_s0 + $0x19] sm:$0xff]  ;;  %v83_v25 = vld [vmem:[%s3671_s0 + $0x21] sm:$0xff] }
   0x5   :  { %v711_v21 = vunpack.c.l.b16 %v117_v9  ;;  %v706_v22 = vunpack.c.l.b16 %v112_v10  ;;  %v707_v23 = vunpack.c.l.b16 %v113_v11  ;;  %v123_v24 = vpack.c.bf16 %v91_v13, %v91_v13  ;;  %v96_v35 = vld [vmem:[%s3671_s0 + $0xc1] sm:$0xff]  ;;  %v97_v36 = vld [vmem:[%s3671_s0 + $0xc9] sm:$0xff]  ;;  %v95_v41 = vld [vmem:[%s3671_s0 + $0xb1] sm:$0xff] }
   0x6   :  { %v742_v26 = vpack.c.b16 %v715_v16, %v714_v15  ;;  %v118_v27 = vpack.c.bf16 %v86_v14, %v86_v14  ;;  %v119_v28 = vpack.c.bf16 %v87_v19, %v87_v19  ;;  %v114_v31 = vpack.c.bf16 %v82_v20, %v82_v20  ;;  %v94_v40 = vld [vmem:[%s3671_s0 + $0xa9] sm:$0xff]  ;;  %v92_v43 = vld [vmem:[%s3671_s0 + $0x91] sm:$0xff]  ;;  %v93_v44 = vld [vmem:[%s3671_s0 + $0x99] sm:$0xff] }
   0x7   :  { %v740_v29 = vpack.c.b16 %v711_v21, %v710_v17  ;;  %v738_v30 = vpack.c.b16 %v707_v23, %v706_v22  ;;  %v716_v32 = vunpack.c.l.b16 %v122_v18  ;;  %v717_v33 = vunpack.c.l.b16 %v123_v24 }
   0x8   :  { %762 = vrot.lane.b32.xlu2 %v742_v26, %s2399_s9  ;;  %v115_v34 = vpack.c.bf16 %v83_v25, %v83_v25  ;;  %v712_v37 = vunpack.c.l.b16 %v118_v27  ;;  %v713_v38 = vunpack.c.l.b16 %v119_v28  ;;  %v708_v39 = vunpack.c.l.b16 %v114_v31 }
   0x9   :  { %758 = vrot.lane.b32.xlu1 %v740_v29, %s2399_s9  ;;  %754 = vrot.lane.b32.xlu0 %v738_v30, %s2399_s9  ;;  %v128_v45 = vpack.c.bf16 %v96_v35, %v96_v35  ;;  %v743_v46 = vpack.c.b16 %v717_v33, %v716_v32  ;;  %v129_v47 = vpack.c.bf16 %v97_v36, %v97_v36 }
   0xa   :  { %v709_v42 = vunpack.c.l.b16 %v115_v34  ;;  %v126_v48 = vpack.c.bf16 %v94_v40, %v94_v40  ;;  %v127_v49 = vpack.c.bf16 %v95_v41, %v95_v41  ;;  %v741_v50 = vpack.c.b16 %v713_v38, %v712_v37 }
   0xb   :  { %v124_v52 = vpack.c.bf16 %v92_v43, %v92_v43  ;;  %v125_v53 = vpack.c.bf16 %v93_v44, %v93_v44 }
   0xc   :  { %v2488_v51 = vpack.c.b16 %v709_v42, %v708_v39 }
   0xd   :  { %8 = vsyncpa [#allocation3], 0  ;;  %v722_v54 = vunpack.c.l.b16 %v128_v45  ;;  %v723_v55 = vunpack.c.l.b16 %v129_v47  ;;  %v720_v56 = vunpack.c.l.b16 %v126_v48  ;;  %v721_v57 = vunpack.c.l.b16 %v127_v49  ;;  %v102_v58 = vld [vmem:[%s3671_s0 + $0x109] sm:$0xff]  ;;  %v103_v61 = vld [vmem:[%s3671_s0 + $0x111] sm:$0xff]  ;;  %s2400_s18 = smov 18   ;;  %s2401_s29 = smov 27  }
   0xe   :  { %v718_v59 = vunpack.c.l.b16 %v124_v52  ;;  %v719_v60 = vunpack.c.l.b16 %v125_v53  ;;  %v100_v62 = vld [vmem:[%s3671_s0 + $0xf1] sm:$0xff]  ;;  %v101_v63 = vld [vmem:[%s3671_s0 + $0xf9] sm:$0xff]  ;;  %v99_v1 = vld [vmem:[%s3671_s0 + $0xe1] sm:$0xff]  ;;  %v134_v2 = vpack.c.bf16 %v102_v58, %v102_v58  ;;  %v135_v5 = vpack.c.bf16 %v103_v61, %v103_v61  ;;  %s2402_s23 = smov 36   ;;  %s2404_s24 = smov 45  }
   0xf   :  { %v98_v0 = vld [vmem:[%s3671_s0 + $0xd9] sm:$0xff]  ;;  %v746_v3 = vpack.c.b16 %v723_v55, %v722_v54  ;;  %v745_v4 = vpack.c.b16 %v721_v57, %v720_v56  ;;  %v132_v6 = vpack.c.bf16 %v100_v62, %v100_v62  ;;  %v133_v8 = vpack.c.bf16 %v101_v63, %v101_v63  ;;  %v108_v13 = vld [vmem:[%s3671_s0 + $0x151] sm:$0xff]  ;;  %v107_v20 = vld [vmem:[%s3671_s0 + $0x141] sm:$0xff]  ;;  %s2405_s6 = smov 63   ;;  %s2406_s15 = smov 72  }
  0x10   :  { %764 = vrot.lane.b32.xlu2 %v743_v46, %s2399_s9  ;;  %v744_v7 = vpack.c.b16 %v719_v60, %v718_v59  ;;  %v130_v9 = vpack.c.bf16 %v98_v0, %v98_v0  ;;  %v131_v10 = vpack.c.bf16 %v99_v1, %v99_v1  ;;  %v728_v11 = vunpack.c.l.b16 %v134_v2  ;;  %v109_v14 = vld [vmem:[%s3671_s0 + $0x159] sm:$0xff]  ;;  %v104_v21 = vld [vmem:[%s3671_s0 + $0x121] sm:$0xff]  ;;  %v105_v22 = vld [vmem:[%s3671_s0 + $0x129] sm:$0xff]  ;;  %s2097_s5 = sshll.u32 %s3674_s3, 4  ;;  %s2409_s7 = smov 64   ;;  %s2098_s5 = int_to_ptr.hbm [resolvable:$true] %s2097_s5 }
  0x11   :  { %760 = vrot.lane.b32.xlu1 %v741_v50, %s2399_s9  ;;  %756 = vrot.lane.b32.xlu0 %v2488_v51, %s2399_s9  ;;  %v729_v12 = vunpack.c.l.b16 %v135_v5  ;;  %v726_v15 = vunpack.c.l.b16 %v132_v6  ;;  %v727_v16 = vunpack.c.l.b16 %v133_v8  ;;  %v106_v19 = vld [vmem:[%s3671_s0 + $0x139] sm:$0xff]  ;;  %v140_v23 = vpack.c.bf16 %v108_v13, %v108_v13  ;;  %v147_v39 = vld [vmem:[%s3671_s0 + $0x22] sm:$0xff]  ;;  %s2410_s8 = smov 4  }
  0x12   :  { %v724_v17 = vunpack.c.l.b16 %v130_v9  ;;  %v725_v18 = vunpack.c.l.b16 %v131_v10  ;;  %v141_v24 = vpack.c.bf16 %v109_v14, %v109_v14  ;;  %v138_v26 = vpack.c.bf16 %v106_v19, %v106_v19  ;;  %v146_v36 = vld [vmem:[%s3671_s0 + $0x1a] sm:$0xff]  ;;  %v144_v40 = vld [vmem:[%s3671_s0 + $0x2] sm:$0xff]  ;;  %v145_v41 = vld [vmem:[%s3671_s0 + $0xa] sm:$0xff] }
  0x13   :  { %v749_v25 = vpack.c.b16 %v729_v12, %v728_v11  ;;  %v139_v27 = vpack.c.bf16 %v107_v20, %v107_v20  ;;  %v2533_v28 = vpack.c.b16 %v727_v16, %v726_v15  ;;  %v136_v30 = vpack.c.bf16 %v104_v21, %v104_v21  ;;  %v110_v42 = vld [vmem:[%s3671_s0 + $0x169] sm:$0xff]  ;;  %v111_v43 = vld [vmem:[%s3671_s0 + $0x171] sm:$0xff]  ;;  %v149_v1 = vld [vmem:[%s3671_s0 + $0x3a] sm:$0xff] }
  0x14   :  { %v2535_v29 = vpack.c.b16 %v725_v18, %v724_v17  ;;  %v137_v31 = vpack.c.bf16 %v105_v22, %v105_v22  ;;  %v734_v32 = vunpack.c.l.b16 %v140_v23  ;;  %v735_v33 = vunpack.c.l.b16 %v141_v24  ;;  %v152_v56 = vld [vmem:[%s3671_s0 + $0x62] sm:$0xff]  ;;  %v153_v57 = vld [vmem:[%s3671_s0 + $0x6a] sm:$0xff]  ;;  %v151_v63 = vld [vmem:[%s3671_s0 + $0x52] sm:$0xff] }
  0x15   :  { %v732_v34 = vunpack.c.l.b16 %v138_v26  ;;  %v733_v35 = vunpack.c.l.b16 %v139_v27  ;;  %v730_v37 = vunpack.c.l.b16 %v136_v30  ;;  %v178_v46 = vpack.c.bf16 %v146_v36, %v146_v36  ;;  %v150_v62 = vld [vmem:[%s3671_s0 + $0x4a] sm:$0xff]  ;;  %v148_v0 = vld [vmem:[%s3671_s0 + $0x32] sm:$0xff]  ;;  %v157_v20 = vld [vmem:[%s3671_s0 + $0x9a] sm:$0xff] }
  0x16   :  { %v731_v38 = vunpack.c.l.b16 %v137_v31  ;;  %v2560_v44 = vpack.c.b16 %v735_v33, %v734_v32  ;;  %v179_v47 = vpack.c.bf16 %v147_v39, %v147_v39  ;;  %v176_v48 = vpack.c.bf16 %v144_v40, %v144_v40  ;;  %v158_v15 = vld [vmem:[%s3671_s0 + $0xaa] sm:$0xff]  ;;  %v159_v16 = vld [vmem:[%s3671_s0 + $0xb2] sm:$0xff]  ;;  %v154_v21 = vld [vmem:[%s3671_s0 + $0x7a] sm:$0xff] }
  0x17   :  { %v2562_v45 = vpack.c.b16 %v733_v35, %v732_v34  ;;  %v177_v50 = vpack.c.bf16 %v145_v41, %v145_v41  ;;  %v142_v52 = vpack.c.bf16 %v110_v42, %v110_v42  ;;  %v143_v53 = vpack.c.bf16 %v111_v43, %v111_v43  ;;  %v156_v19 = vld [vmem:[%s3671_s0 + $0x92] sm:$0xff]  ;;  %v155_v22 = vld [vmem:[%s3671_s0 + $0x82] sm:$0xff] }
  0x18   :  { %770 = vrot.lane.b32.xlu2 %v746_v3, %s2399_s9  ;;  %v750_v49 = vpack.c.b16 %v731_v38, %v730_v37  ;;  %v820_v54 = vunpack.c.l.b16 %v178_v46  ;;  %v821_v55 = vunpack.c.l.b16 %v179_v47  ;;  %v818_v58 = vunpack.c.l.b16 %v176_v48  ;;  %v164_v36 = vld [vmem:[%s3671_s0 + $0xf2] sm:$0xff]  ;;  %v165_v37 = vld [vmem:[%s3671_s0 + $0xfa] sm:$0xff]  ;;  %v163_v39 = vld [vmem:[%s3671_s0 + $0xe2] sm:$0xff] }
  0x19   :  { %768 = vrot.lane.b32.xlu1 %v745_v4, %s2399_s9  ;;  %766 = vrot.lane.b32.xlu0 %v744_v7, %s2399_s9  ;;  %v819_v59 = vunpack.c.l.b16 %v177_v50  ;;  %v736_v60 = vunpack.c.l.b16 %v142_v52  ;;  %v737_v61 = vunpack.c.l.b16 %v143_v53  ;;  %v184_v2 = vpack.c.bf16 %v152_v56, %v152_v56  ;;  %v162_v38 = vld [vmem:[%s3671_s0 + $0xda] sm:$0xff]  ;;  %v160_v46 = vld [vmem:[%s3671_s0 + $0xc2] sm:$0xff] }
  0x1a   :  { %v851_v3 = vpack.c.b16 %v821_v55, %v820_v54  ;;  %v185_v4 = vpack.c.bf16 %v153_v57, %v153_v57  ;;  %v182_v5 = vpack.c.bf16 %v150_v62, %v150_v62  ;;  %v183_v6 = vpack.c.bf16 %v151_v63, %v151_v63  ;;  %v161_v47 = vld [vmem:[%s3671_s0 + $0xca] sm:$0xff] }
  0x1b   :  { %v850_v7 = vpack.c.b16 %v819_v59, %v818_v58  ;;  %v753_v8 = vpack.c.b16 %v737_v61, %v736_v60  ;;  %v180_v9 = vpack.c.bf16 %v148_v0, %v148_v0  ;;  %v181_v10 = vpack.c.bf16 %v149_v1, %v149_v1  ;;  %v170_v0 = vld [vmem:[%s3671_s0 + $0x13a] sm:$0xff]  ;;  %v171_v1 = vld [vmem:[%s3671_s0 + $0x142] sm:$0xff] }
  0x1c   :  { %v826_v11 = vunpack.c.l.b16 %v184_v2  ;;  %v827_v12 = vunpack.c.l.b16 %v185_v4  ;;  %v824_v13 = vunpack.c.l.b16 %v182_v5  ;;  %v825_v14 = vunpack.c.l.b16 %v183_v6  ;;  %v168_v2 = vld [vmem:[%s3671_s0 + $0x122] sm:$0xff]  ;;  %v166_v4 = vld [vmem:[%s3671_s0 + $0x10a] sm:$0xff]  ;;  %v167_v5 = vld [vmem:[%s3671_s0 + $0x112] sm:$0xff] }
  0x1d   :  { %v822_v17 = vunpack.c.l.b16 %v180_v9  ;;  %v823_v18 = vunpack.c.l.b16 %v181_v10  ;;  %v190_v23 = vpack.c.bf16 %v158_v15, %v158_v15  ;;  %v191_v24 = vpack.c.bf16 %v159_v16, %v159_v16 }
  0x1e   :  { %v853_v26 = vpack.c.b16 %v825_v14, %v824_v13  ;;  %v188_v27 = vpack.c.bf16 %v156_v19, %v156_v19  ;;  %v189_v31 = vpack.c.bf16 %v157_v20, %v157_v20  ;;  %v186_v32 = vpack.c.bf16 %v154_v21, %v154_v21  ;;  %v174_v19 = vld [vmem:[%s3671_s0 + $0x16a] sm:$0xff]  ;;  %v175_v20 = vld [vmem:[%s3671_s0 + $0x172] sm:$0xff] }
  0x1f   :  { %v852_v30 = vpack.c.b16 %v823_v18, %v822_v17  ;;  %v187_v33 = vpack.c.bf16 %v155_v22, %v155_v22  ;;  %v832_v34 = vunpack.c.l.b16 %v190_v23  ;;  %v833_v35 = vunpack.c.l.b16 %v191_v24  ;;  %v2109_v17 = vld [vmem:[%s3671_s0 + $0x18] sm:$0xff]  ;;  %v2110_v18 = vld [vmem:[%s3671_s0 + $0x20] sm:$0xff] }
  0x20   :  { %776 = vrot.lane.b32.xlu2 %v749_v25, %s2399_s9  ;;  %v854_v25 = vpack.c.b16 %v827_v12, %v826_v11  ;;  %v830_v40 = vunpack.c.l.b16 %v188_v27  ;;  %v831_v41 = vunpack.c.l.b16 %v189_v31  ;;  %v828_v42 = vunpack.c.l.b16 %v186_v32 }
  0x21   :  { %774 = vrot.lane.b32.xlu1 %v2533_v28, %s2399_s9  ;;  %772 = vrot.lane.b32.xlu0 %v2535_v29, %s2399_s9  ;;  %v829_v43 = vunpack.c.l.b16 %v187_v33  ;;  %v857_v48 = vpack.c.b16 %v833_v35, %v832_v34  ;;  %v197_v50 = vpack.c.bf16 %v165_v37, %v165_v37  ;;  %v194_v52 = vpack.c.bf16 %v162_v38, %v162_v38 }
  0x22   :  { %v195_v53 = vpack.c.bf16 %v163_v39, %v163_v39  ;;  %v192_v54 = vpack.c.bf16 %v160_v46, %v160_v46  ;;  %v193_v55 = vpack.c.bf16 %v161_v47, %v161_v47  ;;  %v856_v56 = vpack.c.b16 %v831_v41, %v830_v40  ;;  %v2115_v46 = vld [vmem:[%s3671_s0 + $0x60] sm:$0xff]  ;;  %v2116_v47 = vld [vmem:[%s3671_s0 + $0x68] sm:$0xff] }
  0x23   :  { %v2629_v57 = vpack.c.b16 %v829_v43, %v828_v42  ;;  %v839_v59 = vunpack.c.l.b16 %v197_v50  ;;  %v836_v60 = vunpack.c.l.b16 %v194_v52  ;;  %v202_v6 = vpack.c.bf16 %v170_v0, %v170_v0  ;;  %v2111_v50 = vld [vmem:[%s3671_s0 + $0x30] sm:$0xff]  ;;  %v2112_v52 = vld [vmem:[%s3671_s0 + $0x38] sm:$0xff] }
  0x24   :  { %v837_v61 = vunpack.c.l.b16 %v195_v53  ;;  %v834_v62 = vunpack.c.l.b16 %v192_v54  ;;  %v835_v63 = vunpack.c.l.b16 %v193_v55  ;;  %v200_v11 = vpack.c.bf16 %v168_v2, %v168_v2  ;;  %v2122_v2 = vld [vmem:[%s3671_s0 + $0xb0] sm:$0xff] }
  0x25   :  { %v198_v13 = vpack.c.bf16 %v166_v4, %v166_v4  ;;  %v199_v14 = vpack.c.bf16 %v167_v5, %v167_v5  ;;  %v844_v15 = vunpack.c.l.b16 %v202_v6  ;;  %v242_v31 = vpack.c.bf16 %v2110_v18, %v2110_v18  ;;  %v2120_v4 = vld [vmem:[%s3671_s0 + $0x98] sm:$0xff] }
  0x26   :  { %v2655_v9 = vpack.c.b16 %v837_v61, %v836_v60  ;;  %v858_v10 = vpack.c.b16 %v835_v63, %v834_v62  ;;  %v842_v21 = vunpack.c.l.b16 %v200_v11  ;;  %v206_v32 = vpack.c.bf16 %v174_v19, %v174_v19  ;;  %v2117_v11 = vld [vmem:[%s3671_s0 + $0x78] sm:$0xff] }
  0x27   :  { %v840_v23 = vunpack.c.l.b16 %v198_v13  ;;  %v841_v24 = vunpack.c.l.b16 %v199_v14  ;;  %v207_v33 = vpack.c.bf16 %v175_v20, %v175_v20  ;;  %v931_v39 = vunpack.c.l.b16 %v242_v31  ;;  %v2127_v31 = vld [vmem:[%s3671_s0 + $0xf0] sm:$0xff] }
  0x28   :  { %782 = vrot.lane.b32.xlu2 %v2560_v44, %s2399_s9  ;;  %v848_v40 = vunpack.c.l.b16 %v206_v32  ;;  %v247_v53 = vpack.c.bf16 %v2115_v46, %v2115_v46  ;;  %v248_v54 = vpack.c.bf16 %v2116_v47, %v2116_v47  ;;  %v243_v61 = vpack.c.bf16 %v2111_v50, %v2111_v50  ;;  %v2128_v32 = vld [vmem:[%s3671_s0 + $0xf8] sm:$0xff] }
  0x29   :  { %780 = vrot.lane.b32.xlu1 %v2562_v45, %s2399_s9  ;;  %778 = vrot.lane.b32.xlu0 %v750_v49, %s2399_s9  ;;  %v196_v49 = vpack.c.bf16 %v164_v36, %v164_v36  ;;  %v861_v37 = vpack.c.b16 %v841_v24, %v840_v23  ;;  %v849_v41 = vunpack.c.l.b16 %v207_v33  ;;  %v244_v62 = vpack.c.bf16 %v2112_v52, %v2112_v52  ;;  %v2125_v33 = vld [vmem:[%s3671_s0 + $0xd8] sm:$0xff] }
  0x2a   :  { %v936_v63 = vunpack.c.l.b16 %v247_v53  ;;  %v937_v0 = vunpack.c.l.b16 %v248_v54  ;;  %v249_v18 = vpack.c.bf16 %v2117_v11, %v2117_v11  ;;  %vm1570_vm0 = vcmask 72704   ;;  %v2133_v53 = vld [vmem:[%s3671_s0 + $0x138] sm:$0xff]  ;;  %v2134_v54 = vld [vmem:[%s3671_s0 + $0x140] sm:$0xff] }
  0x2b   :  { %v838_v58 = vunpack.c.l.b16 %v196_v49  ;;  %v2114_v49 = vld [vmem:[%s3671_s0 + $0x50] sm:$0xff]  ;;  %v257_v46 = vpack.c.bf16 %v2125_v33, %v2125_v33  ;;  %vm1619_vm1 = vcmask 146432   ;;  %vm1652_vm2 = vcmask 220160  }
  0x2c   :  { %v246_v60 = vpack.c.bf16 %v2114_v49, %v2114_v49  ;;  %v965_v13 = vpack.c.b16 %v937_v0, %v936_v63  ;;  %v2129_v0 = vld [vmem:[%s3671_s0 + $0x108] sm:$0xff]  ;;  %vm1931_vm3 = vcmask 1040384   ;;  %vm1685_vm4 = vcmask 293888  }
  0x2d   :  { %v261_v11 = vpack.c.bf16 %v2129_v0, %v2129_v0  ;;  %vm1718_vm5 = vcmask 367616   ;;  %vm1751_vm6 = vcmask 441344   ;;  %vm1784_vm7 = vcmask 515072  }
  0x2e   :  { %v935_v6 = vunpack.c.l.b16 %v246_v60  ;;  %v946_v60 = vunpack.c.l.b16 %v257_v46  ;;  %vm1817_vm8 = vcmask 588800   ;;  %vm1898_vm9 = vcmask 662528  }
  0x2f   :  { %vm2058_vm10 = vcmask 125952  }
  0x30   :  { %868 = vrot.lane.b32.xlu2 %v851_v3, %s2400_s18  ;;  %v169_v3 = vld [vmem:[%s3671_s0 + $0x12a] sm:$0xff] }
  0x31   :  { %866 = vrot.lane.b32.xlu1 %v850_v7, %s2400_s18  ;;  %784 = vrot.lane.b32.xlu0 %v753_v8, %s2399_s9  ;;  %v203_v7 = vpack.c.bf16 %v171_v1, %v171_v1  ;;  %v2653_v8 = vpack.c.b16 %v839_v59, %v838_v58  ;;  %v201_v12 = vpack.c.bf16 %v169_v3, %v169_v3  ;;  %v2121_v1 = vld [vmem:[%s3671_s0 + $0xa8] sm:$0xff]  ;;  %v2119_v3 = vld [vmem:[%s3671_s0 + $0x90] sm:$0xff] }
  0x32   :  { %v253_v14 = vpack.c.bf16 %v2121_v1, %v2121_v1  ;;  %v2130_v1 = vld [vmem:[%s3671_s0 + $0x110] sm:$0xff] }
  0x33   :  { %v845_v16 = vunpack.c.l.b16 %v203_v7  ;;  %v843_v22 = vunpack.c.l.b16 %v201_v12  ;;  %v932_v7 = vunpack.c.l.b16 %v243_v61  ;;  %v2118_v12 = vld [vmem:[%s3671_s0 + $0x80] sm:$0xff] }
  0x34   :  { %v250_v19 = vpack.c.bf16 %v2118_v12, %v2118_v12  ;;  %v262_v12 = vpack.c.bf16 %v2130_v1, %v2130_v1 }
  0x35   :  { %v2680_v27 = vpack.c.b16 %v845_v16, %v844_v15  ;;  %v862_v36 = vpack.c.b16 %v843_v22, %v842_v21  ;;  %v254_v15 = vpack.c.bf16 %v2122_v2, %v2122_v2  ;;  %v251_v16 = vpack.c.bf16 %v2119_v3, %v2119_v3 }
  0x36   :  { %v942_v22 = vunpack.c.l.b16 %v253_v14 }
  0x37   :  { %v943_v23 = vunpack.c.l.b16 %v254_v15  ;;  %v940_v24 = vunpack.c.l.b16 %v251_v16 }
  0x38   :  { %874 = vrot.lane.b32.xlu2 %v854_v25, %s2400_s18  ;;  %v172_v25 = vld [vmem:[%s3671_s0 + $0x152] sm:$0xff] }
  0x39   :  { %872 = vrot.lane.b32.xlu1 %v853_v26, %s2400_s18  ;;  %870 = vrot.lane.b32.xlu0 %v852_v30, %s2400_s18  ;;  %v173_v26 = vld [vmem:[%s3671_s0 + $0x15a] sm:$0xff]  ;;  %v241_v30 = vpack.c.bf16 %v2109_v17, %v2109_v17  ;;  %v204_v34 = vpack.c.bf16 %v172_v25, %v172_v25  ;;  %v252_v17 = vpack.c.bf16 %v2120_v4, %v2120_v4 }
  0x3a   :  { %v205_v35 = vpack.c.bf16 %v173_v26, %v173_v26  ;;  %v938_v26 = vunpack.c.l.b16 %v249_v18 }
  0x3b   :  { %v930_v38 = vunpack.c.l.b16 %v241_v30  ;;  %v846_v42 = vunpack.c.l.b16 %v204_v34  ;;  %v941_v25 = vunpack.c.l.b16 %v252_v17  ;;  %v939_v30 = vunpack.c.l.b16 %v250_v19 }
  0x3c   :  { %v847_v43 = vunpack.c.l.b16 %v205_v35  ;;  %v2126_v35 = vld [vmem:[%s3671_s0 + $0xe0] sm:$0xff]  ;;  %v950_v19 = vunpack.c.l.b16 %v261_v11 }
  0x3d   :  { %v2704_v55 = vpack.c.b16 %v931_v39, %v930_v38  ;;  %v259_v39 = vpack.c.bf16 %v2127_v31, %v2127_v31  ;;  %v258_v47 = vpack.c.bf16 %v2126_v35, %v2126_v35  ;;  %v2135_v31 = vld [vmem:[%s3671_s0 + $0x150] sm:$0xff] }
  0x3e   :  { %v2706_v58 = vpack.c.b16 %v847_v43, %v846_v42  ;;  %v2763_v42 = vpack.c.b16 %v941_v25, %v940_v24  ;;  %v966_v43 = vpack.c.b16 %v939_v30, %v938_v26  ;;  %v2140_v24 = vld [vmem:[%s3671_s0 + $0x188] sm:$0xff]  ;;  %v2138_v30 = vld [vmem:[%s3671_s0 + $0x170] sm:$0xff]  ;;  %v267_v46 = vpack.c.bf16 %v2135_v31, %v2135_v31 }
  0x3f   :  { %v948_v50 = vunpack.c.l.b16 %v259_v39  ;;  %v947_v61 = vunpack.c.l.b16 %v258_v47  ;;  %v2137_v25 = vld [vmem:[%s3671_s0 + $0x168] sm:$0xff]  ;;  %v272_v39 = vpack.c.bf16 %v2140_v24, %v2140_v24 }
  0x40   :  { %880 = vrot.lane.b32.xlu2 %v857_v48, %s2400_s18  ;;  %v2113_v48 = vld [vmem:[%s3671_s0 + $0x48] sm:$0xff] }
  0x41   :  { %878 = vrot.lane.b32.xlu1 %v856_v56, %s2400_s18  ;;  %876 = vrot.lane.b32.xlu0 %v2629_v57, %s2400_s18  ;;  %v865_v56 = vpack.c.b16 %v849_v41, %v848_v40  ;;  %v245_v59 = vpack.c.bf16 %v2113_v48, %v2113_v48  ;;  %v260_v40 = vpack.c.bf16 %v2128_v32, %v2128_v32  ;;  %v2136_v32 = vld [vmem:[%s3671_s0 + $0x158] sm:$0xff] }
  0x42   :  { %v2761_v41 = vpack.c.b16 %v943_v23, %v942_v22  ;;  %v951_v22 = vunpack.c.l.b16 %v262_v12  ;;  %v2139_v23 = vld [vmem:[%s3671_s0 + $0x180] sm:$0xff]  ;;  %v268_v47 = vpack.c.bf16 %v2136_v32, %v2136_v32 }
  0x43   :  { %v934_v5 = vunpack.c.l.b16 %v245_v59  ;;  %v949_v52 = vunpack.c.l.b16 %v260_v40  ;;  %v2132_v59 = vld [vmem:[%s3671_s0 + $0x128] sm:$0xff]  ;;  %v269_v40 = vpack.c.bf16 %v2137_v25, %v2137_v25 }
  0x44   :  { %v2174_v25 = vld [vmem:[%s3671_s0 + $0x22] sm:$0xff] }
  0x45   :  { %v2731_v20 = vpack.c.b16 %v935_v6, %v934_v5  ;;  %v2791_v4 = vpack.c.b16 %v949_v52, %v948_v50  ;;  %v265_v5 = vpack.c.bf16 %v2133_v53, %v2133_v53  ;;  %v266_v6 = vpack.c.bf16 %v2134_v54, %v2134_v54 }
  0x46   :  { %v958_v50 = vunpack.c.l.b16 %v269_v40  ;;  %v956_v53 = vunpack.c.l.b16 %v267_v46  ;;  %v957_v54 = vunpack.c.l.b16 %v268_v47  ;;  %v2245_v47 = vld [vmem:[%s3671_s0 + $0x91] sm:$0xff] }
  0x47   :  { %v954_v15 = vunpack.c.l.b16 %v265_v5  ;;  %v955_v16 = vunpack.c.l.b16 %v266_v6 }
  0x48   :  { %886 = vrot.lane.b32.xlu2 %v2653_v8, %s2400_s18 }
  0x49   :  { %884 = vrot.lane.b32.xlu1 %v2655_v9, %s2400_s18  ;;  %882 = vrot.lane.b32.xlu0 %v858_v10, %s2400_s18  ;;  %v933_v10 = vunpack.c.l.b16 %v244_v62 }
  0x4b   :  { %v2733_v21 = vpack.c.b16 %v933_v10, %v932_v7  ;;  %v264_v10 = vpack.c.bf16 %v2132_v59, %v2132_v59 }
  0x4d   :  { %v953_v18 = vunpack.c.l.b16 %v264_v10 }
  0x50   :  { %892 = vrot.lane.b32.xlu2 %v2680_v27, %s2400_s18 }
  0x51   :  { %890 = vrot.lane.b32.xlu1 %v862_v36, %s2400_s18  ;;  %888 = vrot.lane.b32.xlu0 %v861_v37, %s2400_s18  ;;  %v2123_v36 = vld [vmem:[%s3671_s0 + $0xc0] sm:$0xff]  ;;  %v2124_v37 = vld [vmem:[%s3671_s0 + $0xc8] sm:$0xff] }
  0x52   :  { %v255_v48 = vpack.c.bf16 %v2123_v36, %v2123_v36  ;;  %v256_v49 = vpack.c.bf16 %v2124_v37, %v2124_v37  ;;  %v2825_v36 = vpack.c.b16 %v951_v22, %v950_v19  ;;  %v271_v37 = vpack.c.bf16 %v2139_v23, %v2139_v23 }
  0x54   :  { %v944_v62 = vunpack.c.l.b16 %v255_v48  ;;  %v945_v63 = vunpack.c.l.b16 %v256_v49  ;;  %v960_v48 = vunpack.c.l.b16 %v271_v37  ;;  %v961_v49 = vunpack.c.l.b16 %v272_v39 }
  0x56   :  { %v969_v14 = vpack.c.b16 %v945_v63, %v944_v62  ;;  %v975_v63 = vpack.c.b16 %v957_v54, %v956_v53  ;;  %v2237_v53 = vld [vmem:[%s3671_s0 + $0x31] sm:$0xff]  ;;  %v2238_v54 = vld [vmem:[%s3671_s0 + $0x39] sm:$0xff] }
  0x58   :  { %978 = vrot.lane.b32.xlu2 %v2704_v55, %s2401_s29 }
  0x59   :  { %896 = vrot.lane.b32.xlu1 %v865_v56, %s2400_s18  ;;  %894 = vrot.lane.b32.xlu0 %v2706_v58, %s2400_s18  ;;  %v2131_v56 = vld [vmem:[%s3671_s0 + $0x120] sm:$0xff] }
  0x5a   :  { %v263_v7 = vpack.c.bf16 %v2131_v56, %v2131_v56 }
  0x5c   :  { %v952_v17 = vunpack.c.l.b16 %v263_v7 }
  0x5e   :  { %v2823_v35 = vpack.c.b16 %v953_v18, %v952_v17 }
  0x60   :  { %984 = vrot.lane.b32.xlu2 %v965_v13, %s2401_s29 }
  0x61   :  { %982 = vrot.lane.b32.xlu1 %v2731_v20, %s2401_s29  ;;  %980 = vrot.lane.b32.xlu0 %v2733_v21, %s2401_s29 }
  0x62   :  { %v763_v34 = vpop.permute.xlu2 %762 }
  0x63   :  { %v2759_v38 = vsel %vm1570_vm0, %v965_v13, %v763_v34  ;;  %v2793_v13 = vpack.c.b16 %v947_v61, %v946_v60  ;;  %v2821_v34 = vpack.c.b16 %v955_v16, %v954_v15  ;;  %v977_v61 = vpack.c.b16 %v961_v49, %v960_v48  ;;  %v2246_v48 = vld [vmem:[%s3671_s0 + $0x99] sm:$0xff] }
  0x68   :  { %990 = vrot.lane.b32.xlu2 %v2761_v41, %s2401_s29 }
  0x69   :  { %988 = vrot.lane.b32.xlu1 %v2763_v42, %s2401_s29  ;;  %986 = vrot.lane.b32.xlu0 %v966_v43, %s2401_s29 }
  0x6a   :  { %v765_v2 = vpop.permute.xlu2 %764 }
  0x6b   :  { %v2789_v3 = vsel %vm1570_vm0, %v966_v43, %v765_v2  ;;  %v270_v43 = vpack.c.bf16 %v2138_v30, %v2138_v30 }
  0x6d   :  { %v959_v52 = vunpack.c.l.b16 %v270_v43  ;;  %v370_v43 = vpack.c.bf16 %v2174_v25, %v2174_v25 }
  0x6f   :  { %v2839_v62 = vpack.c.b16 %v959_v52, %v958_v50  ;;  %v506_v50 = vpack.c.bf16 %v2245_v47, %v2245_v47  ;;  %v507_v52 = vpack.c.bf16 %v2246_v48, %v2246_v48  ;;  %v2192_v47 = vld [vmem:[%s3671_s0 + $0xfa] sm:$0xff]  ;;  %v2167_v48 = vld [vmem:[%s3671_s0 + $0x151] sm:$0xff] }
  0x70   :  { %996 = vrot.lane.b32.xlu2 %v2791_v4, %s2401_s29 }
  0x71   :  { %994 = vrot.lane.b32.xlu1 %v2793_v13, %s2401_s29  ;;  %992 = vrot.lane.b32.xlu0 %v969_v14, %s2401_s29 }
  0x72   :  { %v771_v26 = vpop.permute.xlu2 %770 }
  0x73   :  { %v2819_v33 = vsel %vm1570_vm0, %v969_v14, %v771_v26 }
  0x78   :  { %1002 = vrot.lane.b32.xlu2 %v2821_v34, %s2401_s29 }
  0x79   :  { %1000 = vrot.lane.b32.xlu1 %v2823_v35, %s2401_s29  ;;  %998 = vrot.lane.b32.xlu0 %v2825_v36, %s2401_s29 }
  0x7a   :  { %v2833_v56 = vpop.permute.xlu2 %776 }
  0x7b   :  { %v2835_v59 = vpop.permute.xlu1 %758  ;;  %v2837_v60 = vpop.permute.xlu0 %754 }
  0x80   :  { %1008 = vrot.lane.b32.xlu2 %v977_v61, %s2401_s29 }
  0x81   :  { %1006 = vrot.lane.b32.xlu1 %v2839_v62, %s2401_s29  ;;  %1004 = vrot.lane.b32.xlu0 %v975_v63, %s2401_s29  ;;  %s2403_s29 = smov 54  }
  0x82   :  { %v783_v0 = vpop.permute.xlu2 %782 }
  0x83   :  { %v2846_v1 = vsel %vm1570_vm0, %v975_v63, %v783_v0  ;;  %v761_v2 = vpop.permute.xlu1 %760  ;;  %v757_v5 = vpop.permute.xlu0 %756 }
  0x84   :  { %v2850_v6 = vsel %vm1570_vm0, %v2731_v20, %v761_v2  ;;  %v1576_v7 = vsel %vm1570_vm0, %v2704_v55, %v757_v5 }
  0x88   :  { %1114 = vrot.lane.b32.xlu2 %v2562_v45, %s2402_s23 }
  0x89   :  { %1106 = vrot.lane.b32.xlu1 %v2535_v29, %s2402_s23  ;;  %1090 = vrot.lane.b32.xlu0 %v2488_v51, %s2402_s23  ;;  %v2149_v51 = vld [vmem:[%s3671_s0 + $0x79] sm:$0xff]  ;;  %v2150_v29 = vld [vmem:[%s3671_s0 + $0x81] sm:$0xff] }
  0x8a   :  { %v869_v10 = vpop.permute.xlu2 %868  ;;  %v313_v18 = vpack.c.bf16 %v2149_v51, %v2149_v51  ;;  %v2159_v51 = vld [vmem:[%s3671_s0 + $0xf1] sm:$0xff] }
  0x8b   :  { %v2861_v11 = vsel %vm1619_vm1, %v1576_v7, %v869_v10  ;;  %v769_v20 = vpop.permute.xlu1 %768  ;;  %v2863_v12 = vpop.permute.xlu0 %766  ;;  %v498_v7 = vpack.c.bf16 %v2237_v53, %v2237_v53  ;;  %v499_v10 = vpack.c.bf16 %v2238_v54, %v2238_v54 }
  0x8c   :  { %v1594_v55 = vsel %vm1570_vm0, %v2761_v41, %v769_v20  ;;  %v1050_v23 = vunpack.c.l.b16 %v313_v18  ;;  %v1386_v20 = vunpack.c.l.b16 %v506_v50 }
  0x90   :  { %1330 = vrot.lane.b32.xlu2 %v2791_v4, %s2403_s29 }
  0x91   :  { %1226 = vrot.lane.b32.xlu1 %v2680_v27, %s2404_s24  ;;  %1218 = vrot.lane.b32.xlu0 %v2655_v9, %s2404_s24  ;;  %v16_v27 = vld [vmem:[%s3671_s0] sm:$0xff]  ;;  %v17_v9 = vld [vmem:[%s3671_s0 + $0x8] sm:$0xff] }
  0x92   :  { %v875_v45 = vpop.permute.xlu2 %874  ;;  %v48_v19 = vpack.c.bf16 %v16_v27, %v16_v27  ;;  %v49_v22 = vpack.c.bf16 %v17_v9, %v17_v9  ;;  %v2269_v27 = vld [vmem:[%s3671_s0 + $0x32] sm:$0xff]  ;;  %v2270_v9 = vld [vmem:[%s3671_s0 + $0x3a] sm:$0xff] }
  0x93   :  { %v2881_v41 = vsel %vm1619_vm1, %v2759_v38, %v875_v45  ;;  %v775_v14 = vpop.permute.xlu1 %774  ;;  %v773_v15 = vpop.permute.xlu0 %772  ;;  %v314_v38 = vpack.c.bf16 %v2150_v29, %v2150_v29  ;;  %v2277_v29 = vld [vmem:[%s3671_s0 + $0x92] sm:$0xff]  ;;  %v2278_v45 = vld [vmem:[%s3671_s0 + $0x9a] sm:$0xff] }
  0x94   :  { %v1603_v16 = vsel %vm1570_vm0, %v2791_v4, %v775_v14  ;;  %v2893_v17 = vsel %vm1570_vm0, %v2793_v13, %v773_v15  ;;  %v2173_v13 = vld [vmem:[%s3671_s0 + $0x1a] sm:$0xff]  ;;  %v626_v26 = vunpack.c.l.b16 %v48_v19  ;;  %v627_v30 = vunpack.c.l.b16 %v49_v22 }
  0x95   :  { %v1051_v24 = vunpack.c.l.b16 %v314_v38  ;;  %v369_v40 = vpack.c.bf16 %v2173_v13, %v2173_v13  ;;  %v1378_v14 = vunpack.c.l.b16 %v498_v7  ;;  %v1379_v15 = vunpack.c.l.b16 %v499_v10 }
  0x96   :  { %v658_v46 = vpack.c.b16 %v627_v30, %v626_v26  ;;  %v571_v13 = vpack.c.bf16 %v2278_v45, %v2278_v45  ;;  %v562_v30 = vpack.c.bf16 %v2269_v27, %v2269_v27  ;;  %v388_v10 = vpack.c.bf16 %v2192_v47, %v2192_v47 }
  0x97   :  { %v1078_v39 = vpack.c.b16 %v1051_v24, %v1050_v23 }
  0x98   :  { %1450 = vrot.lane.b32.xlu2 %v2560_v44, %s2405_s6  ;;  %v1573_v61 = vsel %vm1570_vm0, %v658_v46, %v2837_v60  ;;  %v2160_v60 = vld [vmem:[%s3671_s0 + $0xf9] sm:$0xff] }
  0x99   :  { %1442 = vrot.lane.b32.xlu1 %v2533_v28, %s2405_s6  ;;  %1338 = vrot.lane.b32.xlu0 %v975_v63, %s2403_s29  ;;  %v324_v24 = vpack.c.bf16 %v2160_v60, %v2160_v60 }
  0x9a   :  { %v881_v4 = vpop.permute.xlu2 %880 }
  0x9b   :  { %v2907_v44 = vsel %vm1619_vm1, %v1594_v55, %v881_v4  ;;  %v781_v31 = vpop.permute.xlu1 %780  ;;  %v779_v32 = vpop.permute.xlu0 %778  ;;  %v1387_v55 = vunpack.c.l.b16 %v507_v52  ;;  %v570_v4 = vpack.c.bf16 %v2277_v29, %v2277_v29 }
  0x9c   :  { %v1612_v28 = vsel %vm1570_vm0, %v2821_v34, %v781_v31  ;;  %v2913_v37 = vsel %vm1570_vm0, %v2823_v35, %v779_v32  ;;  %v1154_v34 = vunpack.c.l.b16 %v369_v40  ;;  %v1155_v35 = vunpack.c.l.b16 %v370_v43 }
  0x9d   :  { %v2966_v38 = vpack.c.b16 %v1387_v55, %v1386_v20  ;;  %v1061_v32 = vunpack.c.l.b16 %v324_v24  ;;  %v1490_v40 = vunpack.c.l.b16 %v562_v30  ;;  %v331_v20 = vpack.c.bf16 %v2167_v48, %v2167_v48  ;;  %v2264_v30 = vld [vmem:[%s3671_s0 + $0x171] sm:$0xff] }
  0x9e   :  { %v1186_v5 = vpack.c.b16 %v1155_v35, %v1154_v34  ;;  %v2168_v34 = vld [vmem:[%s3671_s0 + $0x159] sm:$0xff]  ;;  %v1591_v35 = vsel %vm1570_vm0, %v2763_v42, %v2863_v12  ;;  %v2255_v12 = vld [vmem:[%s3671_s0 + $0x109] sm:$0xff]  ;;  %v1173_v55 = vunpack.c.l.b16 %v388_v10 }
  0x9f   :  { %v516_v27 = vpack.c.bf16 %v2255_v12, %v2255_v12 }
  0xa0   :  { %1098 = vrot.lane.b32.xlu2 %v1078_v39, %s2402_s23  ;;  %v1499_v39 = vunpack.c.l.b16 %v571_v13 }
  0xa1   :  { %1562 = vrot.lane.b32.xlu1 %v2706_v58, %s2406_s15  ;;  %1554 = vrot.lane.b32.xlu0 %v2653_v8, %s2406_s15 }
  0xa2   :  { %v887_v49 = vpop.permute.xlu2 %886 }
  0xa3   :  { %v2935_v63 = vsel %vm1619_vm1, %v1603_v16, %v887_v49  ;;  %v867_v8 = vpop.permute.xlu1 %866  ;;  %v2937_v0 = vpop.permute.xlu0 %784  ;;  %v1579_v16 = vsel %vm1570_vm0, %v2733_v21, %v2835_v59  ;;  %v2976_v59 = vpack.c.b16 %v1379_v15, %v1378_v14 }
  0xa4   :  { %v1621_v2 = vsel %vm1619_vm1, %v1573_v61, %v867_v8  ;;  %v1618_v10 = vsel %vm1570_vm0, %v2839_v62, %v2937_v0  ;;  %v2216_v0 = vld [vmem:[%s3671_s0 + $0xb0] sm:$0xff] }
  0xa8   :  { %1314 = vrot.lane.b32.xlu2 %v2733_v21, %s2403_s29  ;;  %v563_v21 = vpack.c.bf16 %v2270_v9, %v2270_v9 }
  0xa9   :  { %1210 = vrot.lane.b32.xlu1 %v2629_v57, %s2404_s24  ;;  %1202 = vrot.lane.b32.xlu0 %v1186_v5, %s2404_s24  ;;  %v323_v57 = vpack.c.bf16 %v2159_v51, %v2159_v51  ;;  %v1068_v51 = vunpack.c.l.b16 %v331_v20 }
  0xaa   :  { %v893_v18 = vpop.permute.xlu2 %892  ;;  %v1491_v43 = vunpack.c.l.b16 %v563_v21  ;;  %v1606_v21 = vsel %vm1570_vm0, %v2825_v36, %v2833_v56  ;;  %v525_v56 = vpack.c.bf16 %v2264_v30, %v2264_v30 }
  0xab   :  { %v2969_v19 = vsel %vm1619_vm1, %v1612_v28, %v893_v18  ;;  %v873_v22 = vpop.permute.xlu1 %872  ;;  %v871_v23 = vpop.permute.xlu0 %870  ;;  %v1060_v31 = vunpack.c.l.b16 %v323_v57  ;;  %v1498_v28 = vunpack.c.l.b16 %v570_v4  ;;  %v2295_v4 = vld [vmem:[%s3671_s0 + $0x16a] sm:$0xff] }
  0xac   :  { %v1627_v25 = vsel %vm1619_vm1, %v2850_v6, %v873_v22  ;;  %v2974_v26 = vsel %vm1619_vm1, %v1579_v16, %v871_v23  ;;  %v2191_v6 = vld [vmem:[%s3671_s0 + $0xf2] sm:$0xff]  ;;  %v3009_v5 = vpack.c.b16 %v1491_v43, %v1490_v40  ;;  %v1396_v23 = vunpack.c.l.b16 %v516_v27 }
  0xad   :  { %v1083_v53 = vpack.c.b16 %v1061_v32, %v1060_v31  ;;  %v3007_v8 = vpack.c.b16 %v1499_v39, %v1498_v28  ;;  %v387_v7 = vpack.c.bf16 %v2191_v6, %v2191_v6  ;;  %v588_v6 = vpack.c.bf16 %v2295_v4, %v2295_v4 }
  0xb0   :  { %1434 = vrot.lane.b32.xlu2 %v2966_v38, %s2405_s6 }
  0xb1   :  { %1426 = vrot.lane.b32.xlu1 %v2976_v59, %s2405_s6  ;;  %1322 = vrot.lane.b32.xlu0 %v2763_v42, %s2403_s29  ;;  %v332_v42 = vpack.c.bf16 %v2168_v34, %v2168_v34 }
  0xb2   :  { %v979_v46 = vpop.permute.xlu2 %978 }
  0xb3   :  { %v3000_v49 = vsel %vm1652_vm2, %v1621_v2, %v979_v46  ;;  %v879_v50 = vpop.permute.xlu1 %878  ;;  %v877_v52 = vpop.permute.xlu0 %876  ;;  %v2256_v2 = vld [vmem:[%s3671_s0 + $0x111] sm:$0xff]  ;;  %v1069_v60 = vunpack.c.l.b16 %v332_v42 }
  0xb4   :  { %v1633_v54 = vsel %vm1619_vm1, %v1591_v35, %v879_v50  ;;  %v3005_v61 = vsel %vm1619_vm1, %v2789_v3, %v877_v52  ;;  %v1172_v3 = vunpack.c.l.b16 %v387_v7  ;;  %v517_v9 = vpack.c.bf16 %v2256_v2, %v2256_v2 }
  0xb5   :  { %v1087_v22 = vpack.c.b16 %v1069_v60, %v1068_v51  ;;  %v1516_v35 = vunpack.c.l.b16 %v588_v6  ;;  %v2208_v60 = vld [vmem:[%s3671_s0 + $0x50] sm:$0xff] }
  0xb6   :  { %v1195_v57 = vpack.c.b16 %v1173_v55, %v1172_v3  ;;  %v1397_v24 = vunpack.c.l.b16 %v517_v9 }
  0xb8   :  { %1108 = vrot.lane.b32.xlu2 %v1083_v53, %s2402_s23  ;;  %v3059_v39 = vpack.c.b16 %v1397_v24, %v1396_v23 }
  0xb9   :  { %1546 = vrot.lane.b32.xlu1 %v3007_v8, %s2406_s15  ;;  %1538 = vrot.lane.b32.xlu0 %v3009_v5, %s2406_s15 }
  0xba   :  { %v985_v29 = vpop.permute.xlu2 %984 }
  0xbb   :  { %v3023_v45 = vsel %vm1652_vm2, %v1627_v25, %v985_v29  ;;  %v885_v14 = vpop.permute.xlu1 %884  ;;  %v883_v15 = vpop.permute.xlu0 %882  ;;  %v2263_v25 = vld [vmem:[%s3671_s0 + $0x169] sm:$0xff] }
  0xbc   :  { %v1639_v16 = vsel %vm1619_vm1, %v2893_v17, %v885_v14  ;;  %v3029_v18 = vsel %vm1619_vm1, %v2819_v33, %v883_v15  ;;  %v2296_v33 = vld [vmem:[%s3671_s0 + $0x172] sm:$0xff]  ;;  %v2287_v17 = vld [vmem:[%s3671_s0 + $0x10a] sm:$0xff]  ;;  %v524_v34 = vpack.c.bf16 %v2263_v25, %v2263_v25  ;;  %v445_v15 = vpack.c.bf16 %v2216_v0, %v2216_v0 }
  0xbd   :  { %v589_v46 = vpack.c.bf16 %v2296_v33, %v2296_v33  ;;  %v580_v47 = vpack.c.bf16 %v2287_v17, %v2287_v17  ;;  %v2247_v25 = vld [vmem:[%s3671_s0 + $0xa9] sm:$0xff] }
  0xbe   :  { %v1404_v53 = vunpack.c.l.b16 %v524_v34  ;;  %v1277_v4 = vunpack.c.l.b16 %v445_v15  ;;  %v2407_v34 = vmov 0  }
  0xbf   :  { %v1517_v50 = vunpack.c.l.b16 %v589_v46 }
  0xc0   :  { %1228 = vrot.lane.b32.xlu2 %v2706_v58, %s2404_s24  ;;  %v2288_v58 = vld [vmem:[%s3671_s0 + $0x112] sm:$0xff] }
  0xc1   :  { %1220 = vrot.lane.b32.xlu1 %v1195_v57, %s2404_s24  ;;  %1116 = vrot.lane.b32.xlu0 %v1087_v22, %s2402_s23  ;;  %v581_v48 = vpack.c.bf16 %v2288_v58, %v2288_v58  ;;  %v437_v57 = vpack.c.bf16 %v2208_v60, %v2208_v60  ;;  %v2279_v60 = vld [vmem:[%s3671_s0 + $0xaa] sm:$0xff] }
  0xc2   :  { %v991_v13 = vpop.permute.xlu2 %990 }
  0xc3   :  { %v3057_v31 = vsel %vm1652_vm2, %v1633_v54, %v991_v13  ;;  %v891_v32 = vpop.permute.xlu1 %890  ;;  %v889_v28 = vpop.permute.xlu0 %888  ;;  %v1509_v52 = vunpack.c.l.b16 %v581_v48  ;;  %v1405_v54 = vunpack.c.l.b16 %v525_v56  ;;  %v1269_v17 = vunpack.c.l.b16 %v437_v57  ;;  %v1860_v13 = vld [vmem:[%s3672_s1 + $0x28] sm:$0x1] }
  0xc4   :  { %v3063_v40 = vsel %vm1619_vm1, %v2913_v37, %v891_v32  ;;  %v3066_v43 = vsel %vm1619_vm1, %v1606_v21, %v889_v28  ;;  %v1508_v37 = vunpack.c.l.b16 %v580_v47  ;;  %v1886_v58 = vunpack.c.l.b16 %v1860_v13  ;;  %v2248_v21 = vld [vmem:[%s3671_s0 + $0xb1] sm:$0xff] }
  0xc5   :  { %v3089_v51 = vpack.c.b16 %v1405_v54, %v1404_v53  ;;  %v1933_v56 = vsel %vm1931_vm3, 65535, %v2407_v34  ;;  %v508_v53 = vpack.c.bf16 %v2247_v25, %v2247_v25  ;;  %v509_v54 = vpack.c.bf16 %v2248_v21, %v2248_v21  ;;  %v2339_v13 = vld [vmem:[%s3672_s1 + $0x10] sm:$0xff] }
  0xc6   :  { %v3087_v55 = vpack.c.b16 %v1509_v52, %v1508_v37  ;;  %v1892_v32 = vpack.c.b16 %v1886_v58, %v1886_v58  ;;  %v2258_v34 = vld [vmem:[%s3671_s0 + $0x129] sm:$0xff] }
  0xc8   :  { %1444 = vrot.lane.b32.xlu2 %v3059_v39, %s2405_s6  ;;  %v1935_v52 = vand.u32 %v1933_v56, %v1892_v32  ;;  %v2338_v32 = vld [vmem:[%s3672_s1 + $0x8] sm:$0xff]  ;;  %v2337_v56 = vld [vmem:[%s3672_s1] sm:$0xff] }
  0xc9   :  { %1340 = vrot.lane.b32.xlu1 %v2839_v62, %s2403_s29  ;;  %1332 = vrot.lane.b32.xlu0 %v2825_v36, %s2403_s29  ;;  %v3085_v36 = vpack.c.b16 %v1517_v50, %v1516_v35  ;;  %v2215_v62 = vld [vmem:[%s3671_s0 + $0xa8] sm:$0xff] }
  0xca   :  { %v997_v7 = vpop.permute.xlu2 %996  ;;  %v444_v14 = vpack.c.bf16 %v2215_v62, %v2215_v62  ;;  %2343 = vmatpush.bf16.msra.mxu2 %v1935_v52  ;;  %2344 = vmatpush.bf16.msra.mxu3 %v1935_v52 }
  0xcb   :  { %v3078_v20 = vsel %vm1652_vm2, %v1639_v16, %v997_v7  ;;  %v897_v42 = vpop.permute.xlu1 %896  ;;  %v895_v12 = vpop.permute.xlu0 %894  ;;  %1939 = vmatpush.bf16.msra.mxu0 %v1935_v52  ;;  %2342 = vmatpush.bf16.msra.mxu1 %v1935_v52 }
  0xcc   :  { %v1651_v2 = vsel %vm1619_vm1, %v1618_v10, %v897_v42  ;;  %v3083_v3 = vsel %vm1619_vm1, %v2846_v1, %v895_v12  ;;  %v2207_v1 = vld [vmem:[%s3671_s0 + $0x48] sm:$0xff]  ;;  %v1276_v24 = vunpack.c.l.b16 %v444_v14  ;;  %v2280_v14 = vld [vmem:[%s3671_s0 + $0xb2] sm:$0xff] }
  0xcd   :  { %v436_v16 = vpack.c.bf16 %v2207_v1, %v2207_v1 }
  0xce   :  { %v1303_v30 = vpack.c.b16 %v1277_v4, %v1276_v24  ;;  %v572_v4 = vpack.c.bf16 %v2279_v60, %v2279_v60 }
  0xcf   :  { %v1268_v33 = vunpack.c.l.b16 %v436_v16  ;;  %v2340_v16 = vld [vmem:[%s3672_s1 + $0x18] sm:$0xff] }
  0xd0   :  { %1564 = vrot.lane.b32.xlu2 %v3085_v36, %s2406_s15 }
  0xd1   :  { %1556 = vrot.lane.b32.xlu1 %v3087_v55, %s2406_s15  ;;  %1452 = vrot.lane.b32.xlu0 %v3089_v51, %s2405_s6  ;;  %v1299_v47 = vpack.c.b16 %v1269_v17, %v1268_v33  ;;  %v573_v33 = vpack.c.bf16 %v2280_v14, %v2280_v14  ;;  %v2226_v17 = vld [vmem:[%s3671_s0 + $0x128] sm:$0xff] }
  0xd2   :  { %v3109_v29 = vpop.permute.xlu2 %1002 }
  0xd3   :  { %v983_v27 = vpop.permute.xlu1 %982  ;;  %v981_v9 = vpop.permute.xlu0 %980  ;;  %v1501_v58 = vunpack.c.l.b16 %v573_v33  ;;  %v2298_v33 = vld [vmem:[%s3671_s0 + $0x18a] sm:$0xff] }
  0xd4   :  { %v3113_v22 = vsel %vm1652_vm2, %v2974_v26, %v983_v27  ;;  %v3117_v23 = vsel %vm1652_vm2, %v2861_v11, %v981_v9  ;;  %v2271_v26 = vld [vmem:[%s3671_s0 + $0x4a] sm:$0xff]  ;;  %v2272_v11 = vld [vmem:[%s3671_s0 + $0x52] sm:$0xff] }
  0xd5   :  { %v564_v48 = vpack.c.bf16 %v2271_v26, %v2271_v26  ;;  %v565_v37 = vpack.c.bf16 %v2272_v11, %v2272_v11  ;;  %v1500_v26 = vunpack.c.l.b16 %v572_v4 }
  0xd7   :  { %v1492_v42 = vunpack.c.l.b16 %v564_v48  ;;  %v1493_v12 = vunpack.c.l.b16 %v565_v37  ;;  %v2257_v48 = vld [vmem:[%s3671_s0 + $0x121] sm:$0xff] }
  0xd8   :  { %1204 = vrot.lane.b32.xlu2 %v3009_v5, %s2404_s24  ;;  %v2234_v37 = vld [vmem:[%s3671_s0 + $0x188] sm:$0xff] }
  0xd9   :  { %1100 = vrot.lane.b32.xlu1 %v2966_v38, %s2402_s23  ;;  %1092 = vrot.lane.b32.xlu0 %v2976_v59, %s2402_s23  ;;  %v2239_v38 = vld [vmem:[%s3671_s0 + $0x49] sm:$0xff]  ;;  %v2240_v59 = vld [vmem:[%s3671_s0 + $0x51] sm:$0xff]  ;;  %v3178_v9 = vpack.c.b16 %v1493_v12, %v1492_v42  ;;  %v518_v42 = vpack.c.bf16 %v2257_v48, %v2257_v48  ;;  %v519_v12 = vpack.c.bf16 %v2258_v34, %v2258_v34 }
  0xda   :  { %v1009_v5 = vpop.permute.xlu2 %1008  ;;  %v500_v7 = vpack.c.bf16 %v2239_v38, %v2239_v38  ;;  %v501_v10 = vpack.c.bf16 %v2240_v59, %v2240_v59 }
  0xdb   :  { %v3147_v28 = vsel %vm1652_vm2, %v1651_v2, %v1009_v5  ;;  %v989_v6 = vpop.permute.xlu1 %988  ;;  %v987_v46 = vpop.permute.xlu0 %986  ;;  %v1389_v2 = vunpack.c.l.b16 %v509_v54  ;;  %v455_v5 = vpack.c.bf16 %v2226_v17, %v2226_v17  ;;  %v1398_v14 = vunpack.c.l.b16 %v518_v42 }
  0xdc   :  { %v3151_v35 = vsel %vm1652_vm2, %v3005_v61, %v989_v6  ;;  %v3155_v50 = vsel %vm1652_vm2, %v2881_v41, %v987_v46  ;;  %v2341_v61 = vld [vmem:[%s3672_s1 + $0x20] sm:$0xff]  ;;  %v1388_v41 = vunpack.c.l.b16 %v508_v53  ;;  %v1380_v62 = vunpack.c.l.b16 %v500_v7 }
  0xdd   :  { %v1381_v0 = vunpack.c.l.b16 %v501_v10  ;;  %2346 = vmatpush.bf16.msra.mxu2 %v2341_v61  ;;  %2347 = vmatpush.bf16.msra.mxu3 %v2341_v61  ;;  %v3215_v6 = vpack.c.b16 %v1501_v58, %v1500_v26 }
  0xde   :  { %1940 = vmatpush.bf16.msra.mxu0 %v2341_v61  ;;  %2345 = vmatpush.bf16.msra.mxu1 %v2341_v61  ;;  %v3183_v57 = vpack.c.b16 %v1389_v2, %v1388_v41 }
  0xdf   :  { %v3185_v24 = vpack.c.b16 %v1381_v0, %v1380_v62  ;;  %v463_v62 = vpack.c.bf16 %v2234_v37, %v2234_v37  ;;  %v2241_v37 = vld [vmem:[%s3671_s0 + $0x61] sm:$0xff] }
  0xe0   :  { %1324 = vrot.lane.b32.xlu2 %v1303_v30, %s2403_s29  ;;  %v502_v42 = vpack.c.bf16 %v2241_v37, %v2241_v37 }
  0xe1   :  { %1316 = vrot.lane.b32.xlu1 %v1299_v47, %s2403_s29  ;;  %1212 = vrot.lane.b32.xlu0 %v3007_v8, %s2404_s24  ;;  %v1287_v47 = vunpack.c.l.b16 %v455_v5  ;;  %v1295_v4 = vunpack.c.l.b16 %v463_v62  ;;  %v591_v5 = vpack.c.bf16 %v2298_v33, %v2298_v33 }
  0xe2   :  { %v3164_v1 = vpop.permute.xlu2 %1114  ;;  %2349 = vmatpush.bf16.msra.mxu2 %v2340_v16  ;;  %2350 = vmatpush.bf16.msra.mxu3 %v2340_v16  ;;  %v1382_v33 = vunpack.c.l.b16 %v502_v42 }
  0xe3   :  { %v3172_v15 = vpop.permute.xlu1 %994  ;;  %v993_v27 = vpop.permute.xlu0 %992  ;;  %1941 = vmatpush.bf16.msra.mxu0 %v2340_v16  ;;  %2348 = vmatpush.bf16.msra.mxu1 %v2340_v16 }
  0xe4   :  { %v3176_v8 = vsel %vm1652_vm2, %v2907_v44, %v993_v27  ;;  %v2225_v44 = vld [vmem:[%s3671_s0 + $0x120] sm:$0xff]  ;;  %v1399_v27 = vunpack.c.l.b16 %v519_v12 }
  0xe5   :  { %v454_v25 = vpack.c.bf16 %v2225_v44, %v2225_v44  ;;  %v2289_v44 = vld [vmem:[%s3671_s0 + $0x122] sm:$0xff] }
  0xe6   :  { %2352 = vmatpush.bf16.msra.mxu2 %v2339_v13  ;;  %2353 = vmatpush.bf16.msra.mxu3 %v2339_v13  ;;  %v3277_v26 = vpack.c.b16 %v1399_v27, %v1398_v14 }
  0xe7   :  { %1942 = vmatpush.bf16.msra.mxu0 %v2339_v13  ;;  %2351 = vmatpush.bf16.msra.mxu1 %v2339_v13  ;;  %v1286_v46 = vunpack.c.l.b16 %v454_v25 }
  0xe8   :  { %1540 = vrot.lane.b32.xlu2 %v3178_v9, %s2406_s15 }
  0xe9   :  { %1436 = vrot.lane.b32.xlu1 %v3183_v57, %s2405_s6  ;;  %1428 = vrot.lane.b32.xlu0 %v3185_v24, %s2405_s6  ;;  %v1308_v53 = vpack.c.b16 %v1287_v47, %v1286_v46  ;;  %v1519_v46 = vunpack.c.l.b16 %v591_v5 }
  0xea   :  { %v3202_v11 = vpop.permute.xlu2 %1330  ;;  %2355 = vmatpush.bf16.msra.mxu2 %v2338_v32  ;;  %2356 = vmatpush.bf16.msra.mxu3 %v2338_v32 }
  0xeb   :  { %v1001_v30 = vpop.permute.xlu1 %1000  ;;  %v999_v21 = vpop.permute.xlu0 %998  ;;  %1943 = vmatpush.bf16.msra.mxu0 %v2338_v32  ;;  %2354 = vmatpush.bf16.msra.mxu1 %v2338_v32 }
  0xec   :  { %v3206_v38 = vsel %vm1652_vm2, %v3066_v43, %v1001_v30  ;;  %v3210_v59 = vsel %vm1652_vm2, %v2935_v63, %v999_v21  ;;  %v2265_v43 = vld [vmem:[%s3671_s0 + $0x181] sm:$0xff]  ;;  %v2266_v63 = vld [vmem:[%s3671_s0 + $0x189] sm:$0xff]  ;;  %v582_v30 = vpack.c.bf16 %v2289_v44, %v2289_v44 }
  0xed   :  { %v526_v10 = vpack.c.bf16 %v2265_v43, %v2265_v43 }
  0xee   :  { %2358 = vmatpush.bf16.msra.mxu2 %v2337_v56  ;;  %2359 = vmatpush.bf16.msra.mxu3 %v2337_v56  ;;  %v1510_v47 = vunpack.c.l.b16 %v582_v30 }
  0xef   :  { %1944 = vmatpush.bf16.msra.mxu0 %v2337_v56  ;;  %2357 = vmatpush.bf16.msra.mxu1 %v2337_v56  ;;  %v1406_v0 = vunpack.c.l.b16 %v526_v10  ;;  %v2209_v10 = vld [vmem:[%s3671_s0 + $0x60] sm:$0xff] }
  0xf0   :  { %1118 = vrot.lane.b32.xlu2 %v3089_v51, %s2402_s23  ;;  %v2233_v51 = vld [vmem:[%s3671_s0 + $0x180] sm:$0xff]  ;;  %v438_v14 = vpack.c.bf16 %v2209_v10, %v2209_v10 }
  0xf1   :  { %1110 = vrot.lane.b32.xlu1 %v3059_v39, %s2402_s23  ;;  %1548 = vrot.lane.b32.xlu0 %v3215_v6, %s2406_s15  ;;  %v527_v39 = vpack.c.bf16 %v2266_v63, %v2266_v63  ;;  %v462_v2 = vpack.c.bf16 %v2233_v51, %v2233_v51 }
  0xf2   :  { %v3244_v52 = vpop.permute.xlu2 %1450 }
  0xf3   :  { %v1007_v54 = vpop.permute.xlu1 %1006  ;;  %v1005_v7 = vpop.permute.xlu0 %1004  ;;  %v1407_v60 = vunpack.c.l.b16 %v527_v39  ;;  %v1294_v16 = vunpack.c.l.b16 %v462_v2  ;;  %v2210_v39 = vld [vmem:[%s3671_s0 + $0x68] sm:$0xff] }
  0xf4   :  { %v3248_v61 = vsel %vm1652_vm2, %v3083_v3, %v1007_v54  ;;  %v3252_v41 = vsel %vm1652_vm2, %v2969_v19, %v1005_v7  ;;  %v2297_v19 = vld [vmem:[%s3671_s0 + $0x182] sm:$0xff]  ;;  %v439_v27 = vpack.c.bf16 %v2210_v39, %v2210_v39 }
  0xf5   :  { %v3275_v13 = vpack.c.b16 %v1407_v60, %v1406_v0  ;;  %v1312_v58 = vpack.c.b16 %v1295_v4, %v1294_v16  ;;  %v590_v25 = vpack.c.bf16 %v2297_v19, %v2297_v19  ;;  %v2217_v54 = vld [vmem:[%s3671_s0 + $0xc0] sm:$0xff]  ;;  %v2218_v7 = vld [vmem:[%s3671_s0 + $0xc8] sm:$0xff]  ;;  %v1678_v16 = vsel %vm1652_vm2, %v3063_v40, %v3109_v29 }
  0xf6   :  { %v447_v62 = vpack.c.bf16 %v2218_v7, %v2218_v7  ;;  %v1711_v4 = vsel %vm1685_vm4, %v1678_v16, %v3164_v1  ;;  %v1670_v19 = vsel %vm1652_vm2, %v3029_v18, %v3172_v15  ;;  %v1270_v40 = vunpack.c.l.b16 %v438_v14  ;;  %v2281_v18 = vld [vmem:[%s3671_s0 + $0xc2] sm:$0xff]  ;;  %v2282_v15 = vld [vmem:[%s3671_s0 + $0xca] sm:$0xff] }
  0xf7   :  { %v1518_v32 = vunpack.c.l.b16 %v590_v25  ;;  %v1271_v29 = vunpack.c.l.b16 %v439_v27  ;;  %v575_v10 = vpack.c.bf16 %v2282_v15, %v2282_v15 }
  0xf8   :  { %1334 = vrot.lane.b32.xlu2 %v1308_v53, %s2403_s29  ;;  %v2242_v53 = vld [vmem:[%s3671_s0 + $0x69] sm:$0xff]  ;;  %v1279_v25 = vunpack.c.l.b16 %v447_v62 }
  0xf9   :  { %1230 = vrot.lane.b32.xlu1 %v3085_v36, %s2404_s24  ;;  %1222 = vrot.lane.b32.xlu0 %v3087_v55, %s2404_s24  ;;  %v2290_v36 = vld [vmem:[%s3671_s0 + $0x12a] sm:$0xff]  ;;  %v3286_v56 = vpack.c.b16 %v1519_v46, %v1518_v32  ;;  %v503_v2 = vpack.c.bf16 %v2242_v53, %v2242_v53  ;;  %v2249_v46 = vld [vmem:[%s3671_s0 + $0xc1] sm:$0xff]  ;;  %v1300_v37 = vpack.c.b16 %v1271_v29, %v1270_v40 }
  0xfa   :  { %v3262_v3 = vpop.permute.xlu2 %1098  ;;  %v583_v21 = vpack.c.bf16 %v2290_v36, %v2290_v36  ;;  %v574_v53 = vpack.c.bf16 %v2281_v18, %v2281_v18 }
  0xfb   :  { %v1107_v17 = vpop.permute.xlu1 %1106  ;;  %v3273_v55 = vpop.permute.xlu0 %1090  ;;  %v1383_v36 = vunpack.c.l.b16 %v503_v2  ;;  %v510_v2 = vpack.c.bf16 %v2249_v46, %v2249_v46 }
  0xfc   :  { %v1511_v43 = vunpack.c.l.b16 %v583_v21  ;;  %v1703_v44 = vsel %vm1685_vm4, %v1670_v19, %v1107_v17  ;;  %v2273_v17 = vld [vmem:[%s3671_s0 + $0x62] sm:$0xff]  ;;  %v1502_v62 = vunpack.c.l.b16 %v574_v53 }
  0xfd   :  { %v3347_v32 = vpack.c.b16 %v1383_v36, %v1382_v33  ;;  %v566_v39 = vpack.c.bf16 %v2273_v17, %v2273_v17  ;;  %v1390_v14 = vunpack.c.l.b16 %v510_v2 }
  0xfe   :  { %v3288_v51 = vpack.c.b16 %v1511_v43, %v1510_v47  ;;  %v2250_v47 = vld [vmem:[%s3671_s0 + $0xc9] sm:$0xff] }
 0x100   :  { %1454 = vrot.lane.b32.xlu2 %v3275_v13, %s2405_s6 }
 0x101   :  { %1446 = vrot.lane.b32.xlu1 %v3277_v26, %s2405_s6  ;;  %1342 = vrot.lane.b32.xlu0 %v1312_v58, %s2403_s29 }
 0x102   :  { %v3284_v63 = vpop.permute.xlu2 %1314 }
 0x103   :  { %v1227_v48 = vpop.permute.xlu1 %1226  ;;  %v1219_v34 = vpop.permute.xlu0 %1218 }
 0x104   :  { %v1744_v5 = vsel %vm1718_vm5, %v1711_v4, %v1227_v48  ;;  %v1736_v30 = vsel %vm1718_vm5, %v1703_v44, %v1219_v34 }
 0x108   :  { %1094 = vrot.lane.b32.xlu2 %v3185_v24, %s2402_s23  ;;  %v446_v24 = vpack.c.bf16 %v2217_v54, %v2217_v54 }
 0x109   :  { %1566 = vrot.lane.b32.xlu1 %v3286_v56, %s2406_s15  ;;  %1558 = vrot.lane.b32.xlu0 %v3288_v51, %s2406_s15 }
 0x10a   :  { %v3314_v12 = vpop.permute.xlu2 %1434  ;;  %v1278_v58 = vunpack.c.l.b16 %v446_v24  ;;  %v511_v24 = vpack.c.bf16 %v2250_v47, %v2250_v47 }
 0x10b   :  { %v1443_v0 = vpop.permute.xlu1 %1442  ;;  %v1339_v60 = vpop.permute.xlu0 %1338 }
 0x10c   :  { %v1777_v1 = vsel %vm1751_vm6, %v1744_v5, %v1339_v60  ;;  %v1391_v27 = vunpack.c.l.b16 %v511_v24  ;;  %v2227_v5 = vld [vmem:[%s3671_s0 + $0x138] sm:$0xff] }
 0x10d   :  { %v1810_v34 = vsel %vm1784_vm7, %v1777_v1, %v3244_v52  ;;  %v1503_v52 = vunpack.c.l.b16 %v575_v10  ;;  %v456_v17 = vpack.c.bf16 %v2227_v5, %v2227_v5 }
 0x10e   :  { %v3375_v36 = vpack.c.b16 %v1391_v27, %v1390_v14 }
 0x10f   :  { %v3371_v33 = vpack.c.b16 %v1503_v52, %v1502_v62 }
 0x110   :  { %1214 = vrot.lane.b32.xlu2 %v3215_v6, %s2404_s24  ;;  %v1769_v6 = vsel %vm1751_vm6, %v1736_v30, %v3202_v11  ;;  %v2228_v30 = vld [vmem:[%s3671_s0 + $0x140] sm:$0xff] }
 0x111   :  { %1206 = vrot.lane.b32.xlu1 %v3178_v9, %s2404_s24  ;;  %1102 = vrot.lane.b32.xlu0 %v3183_v57, %s2402_s23  ;;  %v1304_v9 = vpack.c.b16 %v1279_v25, %v1278_v58  ;;  %v2274_v57 = vld [vmem:[%s3671_s0 + $0x6a] sm:$0xff]  ;;  %v1802_v11 = vsel %vm1784_vm7, %v1769_v6, %v1443_v0  ;;  %v1494_v0 = vunpack.c.l.b16 %v566_v39  ;;  %v2235_v58 = vld [vmem:[%s3671_s0 + $0x198] sm:$0xff]  ;;  %v457_v6 = vpack.c.bf16 %v2228_v30, %v2228_v30 }
 0x112   :  { %v3345_v21 = vpop.permute.xlu2 %1108  ;;  %v567_v42 = vpack.c.bf16 %v2274_v57, %v2274_v57  ;;  %v2236_v25 = vld [vmem:[%s3671_s0 + $0x1a0] sm:$0xff]  ;;  %v464_v29 = vpack.c.bf16 %v2235_v58, %v2235_v58  ;;  %v1687_v57 = vsel %vm1685_vm4, %v3000_v49, %v3273_v55 }
 0x113   :  { %v1563_v43 = vpop.permute.xlu1 %1562  ;;  %v1555_v48 = vpop.permute.xlu0 %1554  ;;  %v465_v1 = vpack.c.bf16 %v2236_v25, %v2236_v25  ;;  %v2292_v49 = vld [vmem:[%s3671_s0 + $0x142] sm:$0xff] }
 0x114   :  { %v1835_v54 = vsel %vm1817_vm8, %v1802_v11, %v1555_v48  ;;  %v1843_v7 = vsel %vm1817_vm8, %v1810_v34, %v1563_v43  ;;  %v1495_v60 = vunpack.c.l.b16 %v567_v42  ;;  %v1296_v46 = vunpack.c.l.b16 %v464_v29  ;;  %v2299_v29 = vld [vmem:[%s3671_s0 + $0x19a] sm:$0xff] }
 0x115   :  { %2329 = vmatmul.msk.bf16.vlgmr.msra.gmra.mxu2 %vm1898_vm9, %v1835_v54  ;;  %2333 = vmatmul.msk.bf16.vlgmr.msra.gmra.mxu3 %vm1898_vm9, %v1843_v7  ;;  %v1297_v47 = vunpack.c.l.b16 %v465_v1  ;;  %v1288_v48 = vunpack.c.l.b16 %v456_v17  ;;  %v1289_v34 = vunpack.c.l.b16 %v457_v6  ;;  %v2260_v54 = vld [vmem:[%s3671_s0 + $0x141] sm:$0xff]  ;;  %v585_v52 = vpack.c.bf16 %v2292_v49, %v2292_v49 }
 0x116   :  { %v3373_v44 = vpack.c.b16 %v1495_v60, %v1494_v0  ;;  %v521_v27 = vpack.c.bf16 %v2260_v54, %v2260_v54  ;;  %v2300_v1 = vld [vmem:[%s3671_s0 + $0x1a2] sm:$0xff] }
 0x117   :  { %v1313_v53 = vpack.c.b16 %v1297_v47, %v1296_v46  ;;  %v1309_v42 = vpack.c.b16 %v1289_v34, %v1288_v48  ;;  %v2211_v48 = vld [vmem:[%s3671_s0 + $0x78] sm:$0xff]  ;;  %v2212_v34 = vld [vmem:[%s3671_s0 + $0x80] sm:$0xff] }
 0x118   :  { %1430 = vrot.lane.b32.xlu2 %v3347_v32, %s2405_s6  ;;  %v1401_v5 = vunpack.c.l.b16 %v521_v27  ;;  %v441_v49 = vpack.c.bf16 %v2212_v34, %v2212_v34  ;;  %v2244_v54 = vld [vmem:[%s3671_s0 + $0x81] sm:$0xff] }
 0x119   :  { %1326 = vrot.lane.b32.xlu1 %v1304_v9, %s2403_s29  ;;  %1318 = vrot.lane.b32.xlu0 %v1300_v37, %s2403_s29  ;;  %v1695_v9 = vsel %vm1685_vm4, %v3155_v50, %v3262_v3  ;;  %v2291_v50 = vld [vmem:[%s3671_s0 + $0x13a] sm:$0xff] }
 0x11a   :  { %v3369_v16 = vpop.permute.xlu2 %1228  ;;  %v2267_v3 = vld [vmem:[%s3671_s0 + $0x199] sm:$0xff]  ;;  %v584_v2 = vpack.c.bf16 %v2291_v50, %v2291_v50  ;;  %v440_v50 = vpack.c.bf16 %v2211_v48, %v2211_v48 }
 0x11b   :  { %v1211_v4 = vpop.permute.xlu1 %1210  ;;  %v1203_v19 = vpop.permute.xlu0 %1202  ;;  %v528_v0 = vpack.c.bf16 %v2267_v3, %v2267_v3 }
 0x11c   :  { %v1728_v11 = vsel %vm1718_vm5, %v1695_v9, %v1211_v4  ;;  %v1720_v43 = vsel %vm1718_vm5, %v1687_v57, %v1203_v19  ;;  %v1512_v4 = vunpack.c.l.b16 %v584_v2  ;;  %v1513_v19 = vunpack.c.l.b16 %v585_v52 }
 0x11d   :  { %v1753_v55 = vsel %vm1751_vm6, %v1720_v43, %v3284_v63  ;;  %v593_v57 = vpack.c.bf16 %v2300_v1, %v2300_v1 }
 0x11e   :  { %v1533_v17 = vpack.c.b16 %v1513_v19, %v1512_v4 }
 0x11f   :  { %v1521_v47 = vunpack.c.l.b16 %v593_v57 }
 0x120   :  { %1550 = vrot.lane.b32.xlu2 %v3371_v33, %s2406_s15 }
 0x121   :  { %1542 = vrot.lane.b32.xlu1 %v3373_v44, %s2406_s15  ;;  %1438 = vrot.lane.b32.xlu0 %v3375_v36, %s2405_s6 }
 0x122   :  { %v3395_v40 = vpop.permute.xlu2 %1444 }
 0x123   :  { %v1427_v18 = vpop.permute.xlu1 %1426  ;;  %v1323_v15 = vpop.permute.xlu0 %1322 }
 0x124   :  { %v1761_v37 = vsel %vm1751_vm6, %v1728_v11, %v1323_v15  ;;  %v1786_v7 = vsel %vm1784_vm7, %v1753_v55, %v1427_v18  ;;  %v1705_v55 = vsel %vm1685_vm4, %v3078_v20, %v3345_v21 }
 0x125   :  { %v1794_v63 = vsel %vm1784_vm7, %v1761_v37, %v3314_v12  ;;  %v1408_v12 = vunpack.c.l.b16 %v528_v0 }
 0x128   :  { %1224 = vrot.lane.b32.xlu2 %v3288_v51, %s2404_s24 }
 0x129   :  { %1120 = vrot.lane.b32.xlu1 %v3275_v13, %s2402_s23  ;;  %1112 = vrot.lane.b32.xlu0 %v3277_v26, %s2402_s23  ;;  %v2268_v13 = vld [vmem:[%s3671_s0 + $0x1a1] sm:$0xff]  ;;  %v2259_v26 = vld [vmem:[%s3671_s0 + $0x139] sm:$0xff] }
 0x12a   :  { %v3423_v51 = vpop.permute.xlu2 %1564  ;;  %v529_v60 = vpack.c.bf16 %v2268_v13, %v2268_v13  ;;  %v520_v14 = vpack.c.bf16 %v2259_v26, %v2259_v26  ;;  %v2243_v26 = vld [vmem:[%s3671_s0 + $0x79] sm:$0xff] }
 0x12b   :  { %v1547_v10 = vpop.permute.xlu1 %1546  ;;  %v1539_v39 = vpop.permute.xlu0 %1538 }
 0x12c   :  { %v1819_v24 = vsel %vm1817_vm8, %v1786_v7, %v1539_v39  ;;  %v1827_v62 = vsel %vm1817_vm8, %v1794_v63, %v1547_v10  ;;  %v1409_v58 = vunpack.c.l.b16 %v529_v60  ;;  %v1400_v25 = vunpack.c.l.b16 %v520_v14  ;;  %v2219_v7 = vld [vmem:[%s3671_s0 + $0xd8] sm:$0xff] }
 0x12d   :  { %2321 = vmatmul.msk.bf16.vlgmr.msra.gmra.mxu0 %vm1898_vm9, %v1819_v24  ;;  %2325 = vmatmul.msk.bf16.vlgmr.msra.gmra.mxu1 %vm1898_vm9, %v1827_v62  ;;  %v1272_v10 = vunpack.c.l.b16 %v440_v50  ;;  %v1273_v39 = vunpack.c.l.b16 %v441_v49  ;;  %v504_v63 = vpack.c.bf16 %v2243_v26, %v2243_v26  ;;  %v448_v2 = vpack.c.bf16 %v2219_v7, %v2219_v7 }
 0x12e   :  { %v1425_v6 = vpack.c.b16 %v1409_v58, %v1408_v12  ;;  %v1421_v9 = vpack.c.b16 %v1401_v5, %v1400_v25 }
 0x12f   :  { %v1301_v60 = vpack.c.b16 %v1273_v39, %v1272_v10  ;;  %v1384_v58 = vunpack.c.l.b16 %v504_v63  ;;  %v1280_v5 = vunpack.c.l.b16 %v448_v2 }
 0x130   :  { %1344 = vrot.lane.b32.xlu2 %v1313_v53, %s2403_s29 }
 0x131   :  { %1336 = vrot.lane.b32.xlu1 %v1309_v42, %s2403_s29  ;;  %1232 = vrot.lane.b32.xlu0 %v3286_v56, %s2404_s24  ;;  %v592_v56 = vpack.c.bf16 %v2299_v29, %v2299_v29  ;;  %v505_v42 = vpack.c.bf16 %v2244_v54, %v2244_v54 }
 0x132   :  { %v3445_v30 = vpop.permute.xlu2 %1204 }
 0x133   :  { %v1221_v18 = vpop.permute.xlu1 %1220  ;;  %v1117_v15 = vpop.permute.xlu0 %1116  ;;  %v1520_v46 = vunpack.c.l.b16 %v592_v56  ;;  %v1385_v25 = vunpack.c.l.b16 %v505_v42 }
 0x134   :  { %v1738_v53 = vsel %vm1718_vm5, %v1705_v55, %v1221_v18  ;;  %v1713_v13 = vsel %vm1685_vm4, %v3252_v41, %v1117_v15  ;;  %v2220_v41 = vld [vmem:[%s3671_s0 + $0xe0] sm:$0xff] }
 0x135   :  { %v1537_v3 = vpack.c.b16 %v1521_v47, %v1520_v46  ;;  %v1746_v21 = vsel %vm1718_vm5, %v1713_v13, %v3369_v16  ;;  %v449_v0 = vpack.c.bf16 %v2220_v41, %v2220_v41  ;;  %v2252_v16 = vld [vmem:[%s3671_s0 + $0xe1] sm:$0xff]  ;;  %v1413_v56 = vpack.c.b16 %v1385_v25, %v1384_v58 }
 0x136   :  { %v513_v19 = vpack.c.bf16 %v2252_v16, %v2252_v16  ;;  %v2284_v15 = vld [vmem:[%s3671_s0 + $0xe2] sm:$0xff] }
 0x137   :  { %v1281_v29 = vunpack.c.l.b16 %v449_v0  ;;  %v577_v47 = vpack.c.bf16 %v2284_v15, %v2284_v15 }
 0x138   :  { %1560 = vrot.lane.b32.xlu2 %v1533_v17, %s2406_s15  ;;  %v1393_v18 = vunpack.c.l.b16 %v513_v19  ;;  %v2275_v17 = vld [vmem:[%s3671_s0 + $0x7a] sm:$0xff] }
 0x139   :  { %1456 = vrot.lane.b32.xlu1 %v1425_v6, %s2405_s6  ;;  %1448 = vrot.lane.b32.xlu0 %v1421_v9, %s2405_s6  ;;  %v2276_v6 = vld [vmem:[%s3671_s0 + $0x82] sm:$0xff]  ;;  %v1505_v50 = vunpack.c.l.b16 %v577_v47 }
 0x13a   :  { %v3462_v37 = vpop.permute.xlu2 %1324 }
 0x13b   :  { %v1341_v11 = vpop.permute.xlu1 %1340  ;;  %v1333_v43 = vpop.permute.xlu0 %1332 }
 0x13c   :  { %v1771_v20 = vsel %vm1751_vm6, %v1738_v53, %v1333_v43  ;;  %v1779_v24 = vsel %vm1751_vm6, %v1746_v21, %v1341_v11  ;;  %v568_v11 = vpack.c.bf16 %v2275_v17, %v2275_v17  ;;  %v569_v43 = vpack.c.bf16 %v2276_v6, %v2276_v6 }
 0x13e   :  { %v1496_v49 = vunpack.c.l.b16 %v568_v11 }
 0x140   :  { %1104 = vrot.lane.b32.xlu2 %v3375_v36, %s2402_s23  ;;  %v1804_v36 = vsel %vm1784_vm7, %v1771_v20, %v3395_v40 }
 0x141   :  { %1096 = vrot.lane.b32.xlu1 %v3347_v32, %s2402_s23  ;;  %1568 = vrot.lane.b32.xlu0 %v1537_v3, %s2406_s15  ;;  %v2251_v32 = vld [vmem:[%s3671_s0 + $0xd9] sm:$0xff]  ;;  %v1497_v3 = vunpack.c.l.b16 %v569_v43 }
 0x142   :  { %v512_v4 = vpack.c.bf16 %v2251_v32, %v2251_v32  ;;  %v1541_v12 = vpop.permute.xlu2 %1540 }
 0x143   :  { %v1557_v62 = vpop.permute.xlu1 %1556  ;;  %v1453_v52 = vpop.permute.xlu0 %1452  ;;  %v1525_v26 = vpack.c.b16 %v1497_v3, %v1496_v49 }
 0x144   :  { %v1812_v14 = vsel %vm1784_vm7, %v1779_v24, %v1453_v52  ;;  %v1837_v27 = vsel %vm1817_vm8, %v1804_v36, %v1557_v62  ;;  %v1392_v1 = vunpack.c.l.b16 %v512_v4 }
 0x145   :  { %2330 = vmatmul.msk.bf16.gmra.mxu2 %vm1898_vm9, %v1837_v27  ;;  %v1845_v40 = vsel %vm1817_vm8, %v1812_v14, %v3423_v51  ;;  %v2283_v51 = vld [vmem:[%s3671_s0 + $0xda] sm:$0xff] }
 0x146   :  { %2334 = vmatmul.msk.bf16.gmra.mxu3 %vm1898_vm9, %v1845_v40  ;;  %v1417_v57 = vpack.c.b16 %v1393_v18, %v1392_v1  ;;  %v576_v46 = vpack.c.bf16 %v2283_v51, %v2283_v51 }
 0x148   :  { %1320 = vrot.lane.b32.xlu2 %v1301_v60, %s2403_s29  ;;  %v1504_v34 = vunpack.c.l.b16 %v576_v46 }
 0x149   :  { %1216 = vrot.lane.b32.xlu1 %v3371_v33, %s2404_s24  ;;  %1208 = vrot.lane.b32.xlu0 %v3373_v44, %s2404_s24  ;;  %v1305_v44 = vpack.c.b16 %v1281_v29, %v1280_v5 }
 0x14a   :  { %v1119_v48 = vpop.permute.xlu2 %1118  ;;  %v1529_v13 = vpack.c.b16 %v1505_v50, %v1504_v34 }
 0x14b   :  { %v1101_v33 = vpop.permute.xlu1 %1100  ;;  %v1093_v9 = vpop.permute.xlu0 %1092  ;;  %v1715_v14 = vsel %vm1685_vm4, %v3248_v61, %v1119_v48 }
 0x14c   :  { %v1689_v54 = vsel %vm1685_vm4, %v3117_v23, %v1093_v9  ;;  %v1697_v42 = vsel %vm1685_vm4, %v3151_v35, %v1101_v33 }
 0x14d   :  { %v1722_v10 = vsel %vm1718_vm5, %v1689_v54, %v3445_v30 }
 0x150   :  { %1440 = vrot.lane.b32.xlu2 %v1417_v57, %s2405_s6 }
 0x151   :  { %1432 = vrot.lane.b32.xlu1 %v1413_v56, %s2405_s6  ;;  %1328 = vrot.lane.b32.xlu0 %v1305_v44, %s2403_s29 }
 0x152   :  { %v1335_v7 = vpop.permute.xlu2 %1334 }
 0x153   :  { %v1317_v55 = vpop.permute.xlu1 %1316  ;;  %v1213_v53 = vpop.permute.xlu0 %1212 }
 0x154   :  { %v1755_v39 = vsel %vm1751_vm6, %v1722_v10, %v1317_v55  ;;  %v1730_v23 = vsel %vm1718_vm5, %v1697_v42, %v1213_v53 }
 0x155   :  { %v1763_v2 = vsel %vm1751_vm6, %v1730_v23, %v3462_v37 }
 0x159   :  { %1552 = vrot.lane.b32.xlu1 %v1529_v13, %s2406_s15  ;;  %1544 = vrot.lane.b32.xlu0 %v1525_v26, %s2406_s15 }
 0x15a   :  { %v1455_v52 = vpop.permute.xlu2 %1454 }
 0x15b   :  { %v1437_v20 = vpop.permute.xlu1 %1436  ;;  %v1429_v41 = vpop.permute.xlu0 %1428 }
 0x15c   :  { %v1788_v21 = vsel %vm1784_vm7, %v1755_v39, %v1429_v41  ;;  %v1796_v30 = vsel %vm1784_vm7, %v1763_v2, %v1437_v20 }
 0x15d   :  { %v1821_v63 = vsel %vm1817_vm8, %v1788_v21, %v1541_v12 }
 0x15e   :  { %2322 = vmatmul.msk.bf16.gmra.mxu0 %vm1898_vm9, %v1821_v63 }
 0x162   :  { %v1095_v32 = vpop.permute.xlu2 %1094 }
 0x163   :  { %v1111_v24 = vpop.permute.xlu1 %1110  ;;  %v1549_v62 = vpop.permute.xlu0 %1548  ;;  %v1691_v33 = vsel %vm1685_vm4, %v3113_v22, %v1095_v32 }
 0x164   :  { %v1829_v36 = vsel %vm1817_vm8, %v1796_v30, %v1549_v62  ;;  %v1707_v37 = vsel %vm1685_vm4, %v3210_v59, %v1111_v24 }
 0x165   :  { %2326 = vmatmul.msk.bf16.gmra.mxu1 %vm1898_vm9, %v1829_v36 }
 0x16a   :  { %v1215_v19 = vpop.permute.xlu2 %1214 }
 0x16b   :  { %v1231_v0 = vpop.permute.xlu1 %1230  ;;  %v1223_v60 = vpop.permute.xlu0 %1222 }
 0x16c   :  { %v1748_v27 = vsel %vm1718_vm5, %v1715_v14, %v1231_v0  ;;  %v1740_v4 = vsel %vm1718_vm5, %v1707_v37, %v1223_v60 }
 0x16d   :  { %v1773_v12 = vsel %vm1751_vm6, %v1740_v4, %v1335_v7 }
 0x172   :  { %v1431_v59 = vpop.permute.xlu2 %1430 }
 0x173   :  { %v1447_v35 = vpop.permute.xlu1 %1446  ;;  %v1343_v16 = vpop.permute.xlu0 %1342 }
 0x174   :  { %v1781_v40 = vsel %vm1751_vm6, %v1748_v27, %v1343_v16  ;;  %v1806_v58 = vsel %vm1784_vm7, %v1773_v12, %v1447_v35 }
 0x175   :  { %v1814_v29 = vsel %vm1784_vm7, %v1781_v40, %v1455_v52 }
 0x17a   :  { %v1551_v6 = vpop.permute.xlu2 %1550 }
 0x17b   :  { %v1567_v25 = vpop.permute.xlu1 %1566  ;;  %v1559_v5 = vpop.permute.xlu0 %1558 }
 0x17c   :  { %v1839_v61 = vsel %vm1817_vm8, %v1806_v58, %v1559_v5  ;;  %v1847_v1 = vsel %vm1817_vm8, %v1814_v29, %v1567_v25 }
 0x17d   :  { %2331 = vmatmul.msk.bf16.gmra.mxu2 %vm1898_vm9, %v1839_v61  ;;  %2335 = vmatmul.msk.bf16.gmra.mxu3 %vm1898_vm9, %v1847_v1 }
 0x182   :  { %v1225_v50 = vpop.permute.xlu2 %1224 }
 0x183   :  { %v1207_v18 = vpop.permute.xlu1 %1206  ;;  %v1103_v51 = vpop.permute.xlu0 %1102 }
 0x184   :  { %v1724_v9 = vsel %vm1718_vm5, %v1691_v33, %v1207_v18  ;;  %v1699_v56 = vsel %vm1685_vm4, %v3057_v31, %v1103_v51  ;;  %v3573_v31 = vld [vmem:[%s3673_s2] ss:$0 sm:$0xff]  ;;  %s2408_s2 = smov [#allocation2]  }
 0x185   :  { %v1732_v57 = vsel %vm1718_vm5, %v1699_v56, %v1215_v19  ;;  %s2095_s24 = sshll.u32 %s2408_s2, 4  ;;  %s2096_s24 = int_to_ptr.vmem [resolvable:$true] %s2095_s24 }
 0x18a   :  { %v1345_v21 = vpop.permute.xlu2 %1344 }
 0x18b   :  { %v1327_v15 = vpop.permute.xlu1 %1326  ;;  %v1319_v17 = vpop.permute.xlu0 %1318 }
 0x18c   :  { %v1757_v44 = vsel %vm1751_vm6, %v1724_v9, %v1319_v17  ;;  %v1765_v46 = vsel %vm1751_vm6, %v1732_v57, %v1327_v15 }
 0x18d   :  { %v1790_v43 = vsel %vm1784_vm7, %v1757_v44, %v1431_v59 }
 0x192   :  { %v1561_v16 = vpop.permute.xlu2 %1560 }
 0x193   :  { %v1543_v47 = vpop.permute.xlu1 %1542  ;;  %v1439_v11 = vpop.permute.xlu0 %1438 }
 0x194   :  { %v1798_v48 = vsel %vm1784_vm7, %v1765_v46, %v1439_v11  ;;  %v1823_v34 = vsel %vm1817_vm8, %v1790_v43, %v1543_v47 }
 0x195   :  { %2323 = vmatmul.msk.bf16.gmra.mxu0 %vm1898_vm9, %v1823_v34  ;;  %v1831_v22 = vsel %vm1817_vm8, %v1798_v48, %v1551_v6 }
 0x196   :  { %2327 = vmatmul.msk.bf16.gmra.mxu1 %vm1898_vm9, %v1831_v22 }
 0x198   :  { %v1986_v49 = vpop.f32.mrf.mxu2  ;;  %v2006_v3 = vpop.f32.mrf.mxu3 }
 0x199   :  { %v1987_v55 = vadd.f32 %v3573_v31, %v1986_v49  ;;  %v2007_v53 = vadd.f32 %v3573_v31, %v2006_v3 }
 0x19a   :  { %v1105_v51 = vpop.permute.xlu2 %1104 }
 0x19b   :  { %v2042_v13 = vpack.c.bf16 %v1987_v55, %v1987_v55  ;;  %v2050_v26 = vpack.c.bf16 %v2007_v53, %v2007_v53  ;;  %v1121_v54 = vpop.permute.xlu1 %1120  ;;  %v1113_v7 = vpop.permute.xlu0 %1112  ;;  %v1701_v56 = vsel %vm1685_vm4, %v3176_v8, %v1105_v51 }
 0x19c   :  { %v1709_v30 = vsel %vm1685_vm4, %v3206_v38, %v1113_v7  ;;  %v1717_v38 = vsel %vm1685_vm4, %v3147_v28, %v1121_v54 }
 0x19d   :  { %2075 = vst.msk [vmem:[#allocation2 + $0x40] sm:$0xf] %vm2058_vm10, %v2042_v13  ;;  %v1742_v24 = vsel %vm1718_vm5, %v1709_v30, %v1225_v50 }
 0x19e   :  { %2083 = vst.msk [vmem:[#allocation2 + $0x60] sm:$0xf] %vm2058_vm10, %v2050_v26 }
 0x1a0   :  { %v1988_v10 = vpop.f32.mrf.mxu2  ;;  %v2008_v39 = vpop.f32.mrf.mxu3 }
 0x1a1   :  { %v1989_v20 = vadd.f32 %v3573_v31, %v1988_v10  ;;  %v2009_v41 = vadd.f32 %v3573_v31, %v2008_v39 }
 0x1a2   :  { %v1321_v6 = vpop.permute.xlu2 %1320 }
 0x1a3   :  { %v2043_v63 = vpack.c.bf16 %v1989_v20, %v1989_v20  ;;  %v2051_v42 = vpack.c.bf16 %v2009_v41, %v2009_v41  ;;  %v1337_v23 = vpop.permute.xlu1 %1336  ;;  %v1233_v2 = vpop.permute.xlu0 %1232 }
 0x1a4   :  { %v1775_v36 = vsel %vm1751_vm6, %v1742_v24, %v1337_v23  ;;  %v1750_v19 = vsel %vm1718_vm5, %v1717_v38, %v1233_v2 }
 0x1a5   :  { %2076 = vst.msk [vmem:[#allocation2 + $0x44] sm:$0xf] %vm2058_vm10, %v2043_v63  ;;  %v1783_v40 = vsel %vm1751_vm6, %v1750_v19, %v1345_v21 }
 0x1a6   :  { %2084 = vst.msk [vmem:[#allocation2 + $0x64] sm:$0xf] %vm2058_vm10, %v2051_v42 }
 0x1aa   :  { %v1946_v62 = vpop.f32.mrf.mxu0  ;;  %v1966_v52 = vpop.f32.mrf.mxu1 }
 0x1ab   :  { %v1947_v0 = vadd.f32 %v3573_v31, %v1946_v62  ;;  %v1967_v60 = vadd.f32 %v3573_v31, %v1966_v52  ;;  %v1457_v32 = vpop.permute.xlu1 %1456  ;;  %v1449_v35 = vpop.permute.xlu0 %1448 }
 0x1ac   :  { %v1808_v14 = vsel %vm1784_vm7, %v1775_v36, %v1449_v35  ;;  %v1816_v25 = vsel %vm1784_vm7, %v1783_v40, %v1457_v32  ;;  %v1441_v11 = vpop.permute.xlu2 %1440 }
 0x1ad   :  { %v2026_v37 = vpack.c.bf16 %v1947_v0, %v1947_v0  ;;  %v2034_v27 = vpack.c.bf16 %v1967_v60, %v1967_v60  ;;  %v1841_v4 = vsel %vm1817_vm8, %v1808_v14, %v1561_v16 }
 0x1ae   :  { %2332 = vmatmul.msk.bf16.gmra.mxu2 %vm1898_vm9, %v1841_v4 }
 0x1af   :  { %2059 = vst.msk [vmem:[#allocation2] sm:$0xf] %vm2058_vm10, %v2026_v37 }
 0x1b0   :  { %2067 = vst.msk [vmem:[#allocation2 + $0x20] sm:$0xf] %vm2058_vm10, %v2034_v27 }
 0x1b2   :  { %v1948_v12 = vpop.f32.mrf.mxu0  ;;  %v1968_v58 = vpop.f32.mrf.mxu1 }
 0x1b3   :  { %v1949_v5 = vadd.f32 %v3573_v31, %v1948_v12  ;;  %v1969_v29 = vadd.f32 %v3573_v31, %v1968_v58  ;;  %v1097_v61 = vpop.permute.xlu1 %1096  ;;  %v1569_v28 = vpop.permute.xlu0 %1568 }
 0x1b4   :  { %v1849_v1 = vsel %vm1817_vm8, %v1816_v25, %v1569_v28  ;;  %v1693_v44 = vsel %vm1685_vm4, %v3023_v45, %v1097_v61 }
 0x1b5   :  { %v2027_v59 = vpack.c.bf16 %v1949_v5, %v1949_v5  ;;  %v2035_v18 = vpack.c.bf16 %v1969_v29, %v1969_v29  ;;  %2336 = vmatmul.msk.bf16.gmra.mxu3 %vm1898_vm9, %v1849_v1 }
 0x1b7   :  { %2060 = vst.msk [vmem:[#allocation2 + $0x4] sm:$0xf] %vm2058_vm10, %v2027_v59 }
 0x1b8   :  { %2068 = vst.msk [vmem:[#allocation2 + $0x24] sm:$0xf] %vm2058_vm10, %v2035_v18 }
 0x1bb   :  { %v1217_v15 = vpop.permute.xlu1 %1216  ;;  %v1209_v17 = vpop.permute.xlu0 %1208 }
 0x1bc   :  { %v1734_v57 = vsel %vm1718_vm5, %v1701_v56, %v1217_v15  ;;  %v1726_v46 = vsel %vm1718_vm5, %v1693_v44, %v1209_v17 }
 0x1bd   :  { %v1759_v22 = vsel %vm1751_vm6, %v1726_v46, %v1321_v6 }
 0x1c3   :  { %v1433_v33 = vpop.permute.xlu1 %1432  ;;  %v1329_v9 = vpop.permute.xlu0 %1328 }
 0x1c4   :  { %v1767_v47 = vsel %vm1751_vm6, %v1734_v57, %v1329_v9  ;;  %v1792_v8 = vsel %vm1784_vm7, %v1759_v22, %v1433_v33 }
 0x1c5   :  { %v1800_v49 = vsel %vm1784_vm7, %v1767_v47, %v1441_v11 }
 0x1c8   :  { %v1991_v43 = vpop.f32.mrf.mxu2 }
 0x1c9   :  { %v1992_v48 = vadd.f32 %v3573_v31, %v1991_v43  ;;  %v2011_v34 = vpop.f32.mrf.mxu3 }
 0x1ca   :  { %v2012_v50 = vadd.f32 %v3573_v31, %v2011_v34 }
 0x1cb   :  { %v2044_v45 = vpack.c.bf16 %v1992_v48, %v1992_v48  ;;  %v1553_v3 = vpop.permute.xlu1 %1552  ;;  %v1545_v55 = vpop.permute.xlu0 %1544 }
 0x1cc   :  { %v2052_v53 = vpack.c.bf16 %v2012_v50, %v2012_v50  ;;  %v1825_v13 = vsel %vm1817_vm8, %v1792_v8, %v1545_v55  ;;  %v1833_v26 = vsel %vm1817_vm8, %v1800_v49, %v1553_v3 }
 0x1cd   :  { %2077 = vst.msk [vmem:[#allocation2 + $0x48] sm:$0xf] %vm2058_vm10, %v2044_v45  ;;  %2324 = vmatmul.msk.bf16.gmra.mxu0 %vm1898_vm9, %v1825_v13  ;;  %2328 = vmatmul.msk.bf16.gmra.mxu1 %vm1898_vm9, %v1833_v26 }
 0x1ce   :  { %2085 = vst.msk [vmem:[#allocation2 + $0x68] sm:$0xf] %vm2058_vm10, %v2052_v53 }
 0x1d0   :  { %v1993_v54 = vpop.f32.mrf.mxu2 }
 0x1d1   :  { %v1994_v7 = vadd.f32 %v3573_v31, %v1993_v54  ;;  %v2013_v10 = vpop.f32.mrf.mxu3 }
 0x1d2   :  { %v2014_v39 = vadd.f32 %v3573_v31, %v2013_v10 }
 0x1d3   :  { %v2045_v20 = vpack.c.bf16 %v1994_v7, %v1994_v7 }
 0x1d4   :  { %v2053_v41 = vpack.c.bf16 %v2014_v39, %v2014_v39 }
 0x1d5   :  { %2078 = vst.msk [vmem:[#allocation2 + $0x4c] sm:$0xf] %vm2058_vm10, %v2045_v20 }
 0x1d6   :  { %2086 = vst.msk [vmem:[#allocation2 + $0x6c] sm:$0xf] %vm2058_vm10, %v2053_v41 }
 0x1db   :  { %v1951_v21 = vpop.f32.mrf.mxu0 }
 0x1dc   :  { %v1952_v63 = vadd.f32 %v3573_v31, %v1951_v21 }
 0x1de   :  { %v2028_v42 = vpack.c.bf16 %v1952_v63, %v1952_v63 }
 0x1e0   :  { %2061 = vst.msk [vmem:[#allocation2 + $0x8] sm:$0xf] %vm2058_vm10, %v2028_v42 }
 0x1e2   :  { %v1971_v23 = vpop.f32.mrf.mxu1 }
 0x1e3   :  { %v1972_v2 = vadd.f32 %v3573_v31, %v1971_v23  ;;  %v1953_v30 = vpop.f32.mrf.mxu0 }
 0x1e4   :  { %v1954_v24 = vadd.f32 %v3573_v31, %v1953_v30 }
 0x1e5   :  { %v2036_v62 = vpack.c.bf16 %v1972_v2, %v1972_v2 }
 0x1e6   :  { %v2029_v52 = vpack.c.bf16 %v1954_v24, %v1954_v24 }
 0x1e7   :  { %2069 = vst.msk [vmem:[#allocation2 + $0x28] sm:$0xf] %vm2058_vm10, %v2036_v62 }
 0x1e8   :  { %2062 = vst.msk [vmem:[#allocation2 + $0xc] sm:$0xf] %vm2058_vm10, %v2029_v52 }
 0x1ea   :  { %v1973_v36 = vpop.f32.mrf.mxu1 }
 0x1eb   :  { %v1974_v0 = vadd.f32 %v3573_v31, %v1973_v36 }
 0x1ed   :  { %v2037_v60 = vpack.c.bf16 %v1974_v0, %v1974_v0 }
 0x1ef   :  { %2070 = vst.msk [vmem:[#allocation2 + $0x2c] sm:$0xf] %vm2058_vm10, %v2037_v60 }
 0x200   :  { %v1996_v32 = vpop.f32.mrf.mxu2  ;;  %v2016_v35 = vpop.f32.mrf.mxu3 }
 0x201   :  { %v1997_v16 = vadd.f32 %v3573_v31, %v1996_v32  ;;  %v2017_v14 = vadd.f32 %v3573_v31, %v2016_v35 }
 0x203   :  { %v2046_v37 = vpack.c.bf16 %v1997_v16, %v1997_v16  ;;  %v2054_v27 = vpack.c.bf16 %v2017_v14, %v2017_v14 }
 0x205   :  { %2079 = vst.msk [vmem:[#allocation2 + $0x50] sm:$0xf] %vm2058_vm10, %v2046_v37 }
 0x206   :  { %2087 = vst.msk [vmem:[#allocation2 + $0x70] sm:$0xf] %vm2058_vm10, %v2054_v27 }
 0x208   :  { %v1998_v4 = vpop.f32.mrf.mxu2  ;;  %v2018_v38 = vpop.f32.mrf.mxu3 }
 0x209   :  { %v1999_v19 = vadd.f32 %v3573_v31, %v1998_v4  ;;  %v2019_v40 = vadd.f32 %v3573_v31, %v2018_v38 }
 0x20b   :  { %v2047_v12 = vpack.c.bf16 %v1999_v19, %v1999_v19  ;;  %v2055_v58 = vpack.c.bf16 %v2019_v40, %v2019_v40 }
 0x20d   :  { %2080 = vst.msk [vmem:[#allocation2 + $0x54] sm:$0xf] %vm2058_vm10, %v2047_v12 }
 0x20e   :  { %2088 = vst.msk [vmem:[#allocation2 + $0x74] sm:$0xf] %vm2058_vm10, %v2055_v58 }
 0x212   :  { %v1956_v25 = vpop.f32.mrf.mxu0 }
 0x213   :  { %v1957_v5 = vadd.f32 %v3573_v31, %v1956_v25  ;;  %v1976_v29 = vpop.f32.mrf.mxu1 }
 0x214   :  { %v1977_v61 = vadd.f32 %v3573_v31, %v1976_v29 }
 0x215   :  { %v2030_v28 = vpack.c.bf16 %v1957_v5, %v1957_v5 }
 0x216   :  { %v2038_v1 = vpack.c.bf16 %v1977_v61, %v1977_v61 }
 0x217   :  { %2063 = vst.msk [vmem:[#allocation2 + $0x10] sm:$0xf] %vm2058_vm10, %v2030_v28 }
 0x218   :  { %2071 = vst.msk [vmem:[#allocation2 + $0x30] sm:$0xf] %vm2058_vm10, %v2038_v1 }
 0x21a   :  { %v1958_v59 = vpop.f32.mrf.mxu0 }
 0x21b   :  { %v1959_v18 = vadd.f32 %v3573_v31, %v1958_v59  ;;  %v1978_v51 = vpop.f32.mrf.mxu1 }
 0x21c   :  { %v1979_v15 = vadd.f32 %v3573_v31, %v1978_v51 }
 0x21d   :  { %v2031_v17 = vpack.c.bf16 %v1959_v18, %v1959_v18 }
 0x21e   :  { %v2039_v6 = vpack.c.bf16 %v1979_v15, %v1979_v15 }
 0x21f   :  { %2064 = vst.msk [vmem:[#allocation2 + $0x14] sm:$0xf] %vm2058_vm10, %v2031_v17 }
 0x220   :  { %2072 = vst.msk [vmem:[#allocation2 + $0x34] sm:$0xf] %vm2058_vm10, %v2039_v6 }
 0x231   :  { %v2001_v33 = vpop.f32.mrf.mxu2 }
 0x232   :  { %v2002_v9 = vadd.f32 %v3573_v31, %v2001_v33 }
 0x234   :  { %v2048_v56 = vpack.c.bf16 %v2002_v9, %v2002_v9 }
 0x236   :  { %2081 = vst.msk [vmem:[#allocation2 + $0x58] sm:$0xf] %vm2058_vm10, %v2048_v56 }
 0x238   :  { %v2021_v44 = vpop.f32.mrf.mxu3 }
 0x239   :  { %v2022_v57 = vadd.f32 %v3573_v31, %v2021_v44  ;;  %v2003_v46 = vpop.f32.mrf.mxu2 }
 0x23a   :  { %v2004_v47 = vadd.f32 %v3573_v31, %v2003_v46 }
 0x23b   :  { %v2056_v11 = vpack.c.bf16 %v2022_v57, %v2022_v57 }
 0x23c   :  { %v2049_v43 = vpack.c.bf16 %v2004_v47, %v2004_v47 }
 0x23d   :  { %2089 = vst.msk [vmem:[#allocation2 + $0x78] sm:$0xf] %vm2058_vm10, %v2056_v11 }
 0x23e   :  { %2082 = vst.msk [vmem:[#allocation2 + $0x5c] sm:$0xf] %vm2058_vm10, %v2049_v43 }
 0x240   :  { %v2023_v48 = vpop.f32.mrf.mxu3 }
 0x241   :  { %v2024_v34 = vadd.f32 %v3573_v31, %v2023_v48 }
 0x243   :  { %v2057_v22 = vpack.c.bf16 %v2024_v34, %v2024_v34 }
 0x245   :  { %2090 = vst.msk [vmem:[#allocation2 + $0x7c] sm:$0xf] %vm2058_vm10, %v2057_v22 }
 0x24a   :  { %v1961_v50 = vpop.f32.mrf.mxu0  ;;  %v1981_v8 = vpop.f32.mrf.mxu1 }
 0x24b   :  { %v1962_v49 = vadd.f32 %v3573_v31, %v1961_v50  ;;  %v1982_v45 = vadd.f32 %v3573_v31, %v1981_v8 }
 0x24d   :  { %v2032_v3 = vpack.c.bf16 %v1962_v49, %v1962_v49  ;;  %v2040_v55 = vpack.c.bf16 %v1982_v45, %v1982_v45 }
 0x24f   :  { %2065 = vst.msk [vmem:[#allocation2 + $0x18] sm:$0xf] %vm2058_vm10, %v2032_v3 }
 0x250   :  { %2073 = vst.msk [vmem:[#allocation2 + $0x38] sm:$0xf] %vm2058_vm10, %v2040_v55 }
 0x252   :  { %v1963_v53 = vpop.f32.mrf.mxu0  ;;  %v1983_v13 = vpop.f32.mrf.mxu1 }
 0x253   :  { %v1964_v26 = vadd.f32 %v3573_v31, %v1963_v53  ;;  %v1984_v54 = vadd.f32 %v3573_v31, %v1983_v13 }
 0x255   :  { %v2033_v7 = vpack.c.bf16 %v1964_v26, %v1964_v26  ;;  %v2041_v10 = vpack.c.bf16 %v1984_v54, %v1984_v54 }
 0x257   :  { %2066 = vst.msk [vmem:[#allocation2 + $0x1c] sm:$0xf] %vm2058_vm10, %v2033_v7 }
 0x258   :  { %2074 = vst.msk [vmem:[#allocation2 + $0x3c] sm:$0xf] %vm2058_vm10, %v2041_v10 }
 0x259   :  { %2103 = dma.vmem_to_hbm [thread:$0]  %s2096_s24, 2048, %s2098_s5, [#allocation3], %s2409_s7, %s2409_s7, %s2410_s8  }
 0x25a   :  { %2397 = dma.done.wait [#allocation3], 2048  }
 0x25b   :  { %2398 = vsyncadd [#allocation3], 4294965248 }
 0x25c   :  { %2108 = vsyncpa [#allocation3], 1 }

</bundles_post_ra>
